<compile_context>
chip_gen: v7x
topology: tpu7x:2x2x1
jax: 0.10.0
libtpu: 0.0.40
codegen_flags: <defaults>
</compile_context>

<pallas_src>
import functools

import jax
import jax.numpy as jnp
from jax import lax
from jax.experimental import pallas as pl
from jax.experimental.pallas import tpu as pltpu


# ----------------------------- tiling helpers ----------------------------- #

def _cdiv(a, b):
    return -(-a // b)


def _round_up(x, m):
    return _cdiv(x, m) * m


def _m_tiling(M, max_tm=512):
    """M tiles: multiples of 16 (bf16 sublane packing), >=2 tiles when M allows
    so the grid shards across both v7x TensorCores."""
    n_m = max(2, _cdiv(M, max_tm)) if M > 16 else 1
    tm = _round_up(_cdiv(M, n_m), 16)
    return tm, n_m, tm * n_m


def _k_tiling(K, max_tk=2048):
    """Single full-K block when it fits comfortably; else 128-aligned K tiles."""
    if K <= max_tk:
        return K, 1, K
    n_k = _cdiv(K, max_tk)
    tk = _round_up(_cdiv(K, n_k), 128)
    return tk, n_k, tk * n_k


_VMEM_LIMIT = 32 * 1024 * 1024  # explicit scoped-VMEM budget (safe on v5e/v6e/v7x)


# ----------------------------- Pallas kernels ----------------------------- #

def _conv_matmul_kernel(x_ref, w_ref, b_ref, o_ref, acc_ref):
    """One (M-tile, K-tile) step of conv-as-matmul; folded-BN bias + ReLU on the
    last K step. bf16 operands, f32 accumulation in VMEM scratch."""
    k = pl.program_id(1)

    @pl.when(k == 0)
    def _():
        acc_ref[...] = jnp.zeros_like(acc_ref)

    acc_ref[...] += jnp.dot(x_ref[...], w_ref[...],
                            preferred_element_type=jnp.float32)

    @pl.when(k == pl.num_programs(1) - 1)
    def _():
        o_ref[...] = jnp.maximum(acc_ref[...] + b_ref[...], 0.0).astype(o_ref.dtype)


def _maxpool_kernel(p_ref, o_ref):
    """Running max over the KH*KW tap grid axis; output block stays resident."""
    @pl.when(pl.program_id(1) == 0)
    def _():
        o_ref[...] = jnp.full_like(o_ref, -jnp.inf)

    o_ref[...] = jnp.maximum(o_ref[...], p_ref[0])


# ------------------------------ host wrappers ------------------------------ #

def _extract_taps(xp, KH, KW, stride, N, Ho, Wo, C):
    """Strided slices of the padded input, one per kernel tap (glue, plain JAX)."""
    taps = []
    for i in range(KH):
        for j in range(KW):
            taps.append(
                lax.slice(
                    xp,
                    (0, i, j, 0),
                    (N, i + stride * (Ho - 1) + 1, j + stride * (Wo - 1) + 1, C),
                    (1, stride, stride, 1),
                )
            )
    return taps


def conv_bn_relu(x_nhwc, w_oihw, gamma, beta, mean, var, *, stride, padding, eps=1e-3):
    """BasicConv2d: conv(bias=False) -> BatchNorm(eps=1e-3, inference) -> ReLU."""
    N, H, W, Cin = x_nhwc.shape
    Cout, Cin_w, KH, KW = w_oihw.shape
    assert Cin == Cin_w
    Ho = (H + 2 * padding - KH) // stride + 1
    Wo = (W + 2 * padding - KW) // stride + 1
    M = N * Ho * Wo
    K = KH * KW * Cin

    # bf16 activations before any patch extraction (halves the im2col HBM bytes).
    xb = x_nhwc.astype(jnp.bfloat16)
    if KH == 1 and KW == 1 and stride == 1 and padding == 0:
        patches = xb.reshape(M, K)                     # 1x1 conv: free reshape, no im2col
    else:
        xp = jnp.pad(xb, ((0, 0), (padding, padding), (padding, padding), (0, 0)))
        taps = _extract_taps(xp, KH, KW, stride, N, Ho, Wo, Cin)
        # (N, Ho, Wo, KH*KW, Cin) -> (M, K) with K ordered (kh, kw, cin)
        patches = jnp.stack(taps, axis=3).reshape(M, K)
        # TODO(synk): stream the taps from the padded input inside the kernel
        # (manual DMA of shifted windows) to avoid materializing im2col in HBM.

    # Fold BN into the matmul: y = conv * s + (beta - mean * s)
    s = gamma / jnp.sqrt(var + eps)                                   # (Cout,)
    w_mat = jnp.transpose(w_oihw, (2, 3, 1, 0)).reshape(K, Cout) * s[None, :]
    bias = (beta - mean * s).reshape(1, Cout).astype(jnp.float32)

    # Tiling / lane-dense padding.
    tm, n_m, Mp = _m_tiling(M)
    tk, n_k, Kp = _k_tiling(K)
    Cop = _round_up(Cout, 128)

    if (Mp, Kp) != (M, K):
        patches = jnp.pad(patches, ((0, Mp - M), (0, Kp - K)))
    if (Kp, Cop) != (K, Cout):
        w_mat = jnp.pad(w_mat, ((0, Kp - K), (0, Cop - Cout)))
        bias = jnp.pad(bias, ((0, 0), (0, Cop - Cout)))
    w_mat = w_mat.astype(jnp.bfloat16)

    out = pl.pallas_call(
        _conv_matmul_kernel,
        out_shape=jax.ShapeDtypeStruct((Mp, Cop), x_nhwc.dtype),
        grid_spec=pltpu.PrefetchScalarGridSpec(
            num_scalar_prefetch=0,
            grid=(n_m, n_k),
            in_specs=[
                pl.BlockSpec((tm, tk), lambda i, k: (i, k)),
                pl.BlockSpec((tk, Cop), lambda i, k: (k, 0)),
                pl.BlockSpec((1, Cop), lambda i, k: (0, 0)),
            ],
            out_specs=pl.BlockSpec((tm, Cop), lambda i, k: (i, 0)),
            scratch_shapes=[pltpu.VMEM((tm, Cop), jnp.float32)],
        ),
        compiler_params=pltpu.CompilerParams(
            dimension_semantics=("parallel", "arbitrary"),
            vmem_limit_bytes=_VMEM_LIMIT,
        ),
    )(patches, w_mat, bias)

    return out[:M, :Cout].reshape(N, Ho, Wo, Cout)


def max_pool_3x3(x_nhwc, *, stride, padding=1):
    """F.max_pool2d(kernel_size=3, stride=stride, padding=padding) in NHWC."""
    N, H, W, C = x_nhwc.shape
    KH = KW = 3
    Ho = (H + 2 * padding - KH) // stride + 1
    Wo = (W + 2 * padding - KW) // stride + 1
    M = N * Ho * Wo

    xp = jnp.pad(
        x_nhwc,
        ((0, 0), (padding, padding), (padding, padding), (0, 0)),
        constant_values=-jnp.inf,
    )
    taps = _extract_taps(xp, KH, KW, stride, N, Ho, Wo, C)
    p = jnp.stack(taps, axis=0).reshape(KH * KW, M, C)
    # TODO(synk): stream the 9 taps from the padded input inside the kernel to
    # avoid materializing the (KH*KW, M, C) tap stack in HBM.

    tm, n_m, Mp = _m_tiling(M)
    if Mp != M:
        p = jnp.pad(p, ((0, 0), (0, Mp - M), (0, 0)))

    out = pl.pallas_call(
        _maxpool_kernel,
        out_shape=jax.ShapeDtypeStruct((Mp, C), x_nhwc.dtype),
        grid_spec=pltpu.PrefetchScalarGridSpec(
            num_scalar_prefetch=0,
            grid=(n_m, KH * KW),
            in_specs=[pl.BlockSpec((1, tm, C), lambda i, k: (k, i, 0))],
            out_specs=pl.BlockSpec((tm, C), lambda i, k: (i, 0)),
        ),
        compiler_params=pltpu.CompilerParams(
            dimension_semantics=("parallel", "arbitrary"),
            vmem_limit_bytes=_VMEM_LIMIT,
        ),
    )(p)
    return out[:M].reshape(N, Ho, Wo, C)


# ------------------------------ InceptionB ------------------------------ #

def inception_b_forward(x_nchw, params, *, stride=2, padding=1):
    x = jnp.transpose(x_nchw, (0, 2, 3, 1))  # NCHW -> NHWC

    b3x3 = conv_bn_relu(x, *params["branch3x3"], stride=stride, padding=padding)

    dbl = conv_bn_relu(x, *params["dbl_1"], stride=1, padding=0)
    dbl = conv_bn_relu(dbl, *params["dbl_2"], stride=1, padding=1)
    dbl = conv_bn_relu(dbl, *params["dbl_3"], stride=stride, padding=padding)

    pool = max_pool_3x3(x, stride=stride, padding=1)

    # TODO(synk): write the three branches directly into one channel-offset
    # output slab (input_output_aliases) to remove the extra concat pass.
    out = jnp.concatenate([b3x3, dbl, pool], axis=-1)  # torch.cat dim=1 equivalent
    return jnp.transpose(out, (0, 3, 1, 2))  # NHWC -> NCHW


def init_params(key, in_channels):
    def conv_bn(k, cin, cout, ksize):
        k1, k2, k3, k4, k5 = jax.random.split(k, 5)
        w = 0.05 * jax.random.normal(k1, (cout, cin, ksize, ksize), jnp.float32)
        gamma = 1.0 + 0.1 * jax.random.normal(k2, (cout,), jnp.float32)
        beta = 0.1 * jax.random.normal(k3, (cout,), jnp.float32)
        mean = 0.1 * jax.random.normal(k4, (cout,), jnp.float32)
        var = jnp.abs(jax.random.normal(k5, (cout,), jnp.float32)) + 0.5
        return (w, gamma, beta, mean, var)

    k1, k2, k3, k4 = jax.random.split(key, 4)
    return {
        "branch3x3": conv_bn(k1, in_channels, 384, 3),
        "dbl_1": conv_bn(k2, in_channels, 64, 1),
        "dbl_2": conv_bn(k3, 64, 96, 3),
        "dbl_3": conv_bn(k4, 96, 96, 3),
    }


# ------------------------------ Reference ------------------------------ #

def _ref_conv_bn_relu(x_nchw, w, gamma, beta, mean, var, stride, padding, eps=1e-3):
    y = lax.conv_general_dilated(
        x_nchw, w, (stride, stride), [(padding, padding)] * 2,
        dimension_numbers=("NCHW", "OIHW", "NCHW"),
    )
    s = gamma / jnp.sqrt(var + eps)
    y = y * s[None, :, None, None] + (beta - mean * s)[None, :, None, None]
    return jnp.maximum(y, 0.0)


def _ref_inception_b(x_nchw, params, *, stride=2, padding=1):
    b3x3 = _ref_conv_bn_relu(x_nchw, *params["branch3x3"], stride, padding)
    dbl = _ref_conv_bn_relu(x_nchw, *params["dbl_1"], 1, 0)
    dbl = _ref_conv_bn_relu(dbl, *params["dbl_2"], 1, 1)
    dbl = _ref_conv_bn_relu(dbl, *params["dbl_3"], stride, padding)
    pool = lax.reduce_window(
        x_nchw, -jnp.inf, lax.max,
        window_dimensions=(1, 1, 3, 3), window_strides=(1, 1, stride, stride),
        padding=((0, 0), (0, 0), (1, 1), (1, 1)),
    )
    return jnp.concatenate([b3x3, dbl, pool], axis=1)


# ------------------------------ Main ------------------------------ #

if __name__ == "__main__":
    key = jax.random.PRNGKey(0)
    kx, kp = jax.random.split(key)

    N, Cin, H, W = 2, 4, 16, 16
    x = jax.random.normal(kx, (N, Cin, H, W), jnp.float32)
    params = init_params(kp, Cin)

    fwd = jax.jit(functools.partial(inception_b_forward, stride=2, padding=1))
    out = jax.block_until_ready(fwd(x, params))

    expected_channels = 384 + 96 + Cin
    assert out.shape == (N, expected_channels, 8, 8), out.shape

    ref = _ref_inception_b(x, params, stride=2, padding=1)
    max_err = float(jnp.max(jnp.abs(out - ref)))
    # bf16 MXU operands (f32 accumulation) vs. an all-f32 reference.
    assert jnp.allclose(out, ref, rtol=2e-2, atol=2e-2), max_err

    print("KERNEL_OK")
</pallas_src>

<mosaic_0001>
module attributes {stable_mosaic.version = 11 : i64} {
  func.func @_conv_matmul_kernel(%arg0: i32, %arg1: i32, %arg2: memref<256x4xbf16, #tpu.memory_space<vmem>>, %arg3: memref<4x128xbf16, #tpu.memory_space<vmem>>, %arg4: memref<1x128xf32, #tpu.memory_space<vmem>>, %arg5: memref<256x128xf32, #tpu.memory_space<vmem>>, %arg6: memref<256x128xf32, #tpu.memory_space<vmem>>) attributes {dimension_semantics = [#tpu.dimension_semantics<parallel>, #tpu.dimension_semantics<arbitrary>], iteration_bounds = array<i64: 2, 1>, scalar_prefetch = 0 : i64, scratch_operands = 1 : i64, tpu.core_type = #tpu.core_type<tc>, window_params = [{transform_indices = @transform_0, window_bounds = array<i64: 256, 4>}, {transform_indices = @transform_1, window_bounds = array<i64: 4, 128>}, {pipeline_mode = #tpu.pipeline_mode<synchronous>, transform_indices = @transform_2, window_bounds = array<i64: 1, 128>}, {transform_indices = @transform_3, window_bounds = array<i64: 256, 128>}]} {
    %c0_i32 = arith.constant 0 : i32
    %0 = arith.cmpi eq, %arg1, %c0_i32 : i32
    %1 = arith.extui %0 : i1 to i32
    %c0_i32_0 = arith.constant 0 : i32
    %2 = arith.cmpi ne, %1, %c0_i32_0 : i32
    scf.if %2 {
      %cst_10 = arith.constant 0.000000e+00 : f32
      %12 = vector.broadcast %cst_10 : f32 to vector<256x128xf32>
      %c0_11 = arith.constant 0 : index
      %c0_12 = arith.constant 0 : index
      %13 = vector.load %arg6[%c0_11, %c0_12] : memref<256x128xf32, #tpu.memory_space<vmem>>, vector<256x128xf32>
      tpu.vector_store %arg6[%c0_11, %c0_12], %12 {strides = array<i32>} : memref<256x128xf32, #tpu.memory_space<vmem>>, vector<256x128xf32>,
    } else {
    }
    %c0 = arith.constant 0 : index
    %c0_1 = arith.constant 0 : index
    %3 = vector.load %arg6[%c0, %c0_1] : memref<256x128xf32, #tpu.memory_space<vmem>>, vector<256x128xf32>
    %c0_2 = arith.constant 0 : index
    %c0_3 = arith.constant 0 : index
    %4 = vector.load %arg2[%c0_2, %c0_3] : memref<256x4xbf16, #tpu.memory_space<vmem>>, vector<256x4xbf16>
    %c0_4 = arith.constant 0 : index
    %c0_5 = arith.constant 0 : index
    %5 = vector.load %arg3[%c0_4, %c0_5] : memref<4x128xbf16, #tpu.memory_space<vmem>>, vector<4x128xbf16>
    %cst = arith.constant dense<0.000000e+00> : vector<256x128xf32>
    %6 = tpu.matmul %4, %5, %cst {dimension_numbers = #tpu.dot_dimension_numbers<[1], [0], [0], [1], [0, 0, 1, 1], [], []>} : vector<256x4xbf16>, vector<4x128xbf16>, vector<256x128xf32> -> vector<256x128xf32>
    %7 = arith.addf %3, %6 : vector<256x128xf32>
    %c0_6 = arith.constant 0 : index
    %c0_7 = arith.constant 0 : index
    %8 = vector.load %arg6[%c0_6, %c0_7] : memref<256x128xf32, #tpu.memory_space<vmem>>, vector<256x128xf32>
    tpu.vector_store %arg6[%c0_6, %c0_7], %7 {strides = array<i32>} : memref<256x128xf32, #tpu.memory_space<vmem>>, vector<256x128xf32>,
    %c0_i32_8 = arith.constant 0 : i32
    %9 = arith.cmpi eq, %arg1, %c0_i32_8 : i32
    %10 = arith.extui %9 : i1 to i32
    %c0_i32_9 = arith.constant 0 : i32
    %11 = arith.cmpi ne, %10, %c0_i32_9 : i32
    scf.if %11 {
      %c0_10 = arith.constant 0 : index
      %c0_11 = arith.constant 0 : index
      %12 = vector.load %arg6[%c0_10, %c0_11] : memref<256x128xf32, #tpu.memory_space<vmem>>, vector<256x128xf32>
      %c0_12 = arith.constant 0 : index
      %c0_13 = arith.constant 0 : index
      %13 = vector.load %arg4[%c0_12, %c0_13] : memref<1x128xf32, #tpu.memory_space<vmem>>, vector<1x128xf32>
      %14 = vector.broadcast %13 : vector<1x128xf32> to vector<256x128xf32>
      %15 = arith.addf %12, %14 : vector<256x128xf32>
      %cst_14 = arith.constant 0.000000e+00 : f32
      %16 = vector.broadcast %cst_14 : f32 to vector<256x128xf32>
      %17 = arith.maximumf %15, %16 : vector<256x128xf32>
      %c0_15 = arith.constant 0 : index
      %c0_16 = arith.constant 0 : index
      %18 = vector.load %arg5[%c0_15, %c0_16] : memref<256x128xf32, #tpu.memory_space<vmem>>, vector<256x128xf32>
      tpu.vector_store %arg5[%c0_15, %c0_16], %17 {strides = array<i32>} : memref<256x128xf32, #tpu.memory_space<vmem>>, vector<256x128xf32>,
    } else {
    }
    return
  }
  func.func @transform_0(%arg0: i32, %arg1: i32) -> (i32, i32) {
    %c0_i32 = arith.constant 0 : i32
    return %arg0, %arg1 : i32, i32
  }
  func.func @transform_1(%arg0: i32, %arg1: i32) -> (i32, i32) {
    %c0_i32 = arith.constant 0 : i32
    %c0_i32_0 = arith.constant 0 : i32
    return %arg1, %c0_i32 : i32, i32
  }
  func.func @transform_2(%arg0: i32, %arg1: i32) -> (i32, i32) {
    %c0_i32 = arith.constant 0 : i32
    %c0_i32_0 = arith.constant 0 : i32
    %c0_i32_1 = arith.constant 0 : i32
    return %c0_i32, %c0_i32_0 : i32, i32
  }
  func.func @transform_3(%arg0: i32, %arg1: i32) -> (i32, i32) {
    %c0_i32 = arith.constant 0 : i32
    %c0_i32_0 = arith.constant 0 : i32
    return %arg0, %c0_i32 : i32, i32
  }
}

module attributes {stable_mosaic.version = 11 : i64} {
  func.func @_conv_matmul_kernel(%arg0: i32, %arg1: i32, %arg2: memref<256x576xbf16, #tpu.memory_space<vmem>>, %arg3: memref<576x128xbf16, #tpu.memory_space<vmem>>, %arg4: memref<1x128xf32, #tpu.memory_space<vmem>>, %arg5: memref<256x128xf32, #tpu.memory_space<vmem>>, %arg6: memref<256x128xf32, #tpu.memory_space<vmem>>) attributes {dimension_semantics = [#tpu.dimension_semantics<parallel>, #tpu.dimension_semantics<arbitrary>], iteration_bounds = array<i64: 2, 1>, scalar_prefetch = 0 : i64, scratch_operands = 1 : i64, tpu.core_type = #tpu.core_type<tc>, window_params = [{transform_indices = @transform_0, window_bounds = array<i64: 256, 576>}, {transform_indices = @transform_1, window_bounds = array<i64: 576, 128>}, {pipeline_mode = #tpu.pipeline_mode<synchronous>, transform_indices = @transform_2, window_bounds = array<i64: 1, 128>}, {transform_indices = @transform_3, window_bounds = array<i64: 256, 128>}]} {
    %c0_i32 = arith.constant 0 : i32
    %0 = arith.cmpi eq, %arg1, %c0_i32 : i32
    %1 = arith.extui %0 : i1 to i32
    %c0_i32_0 = arith.constant 0 : i32
    %2 = arith.cmpi ne, %1, %c0_i32_0 : i32
    scf.if %2 {
      %cst_10 = arith.constant 0.000000e+00 : f32
      %12 = vector.broadcast %cst_10 : f32 to vector<256x128xf32>
      %c0_11 = arith.constant 0 : index
      %c0_12 = arith.constant 0 : index
      %13 = vector.load %arg6[%c0_11, %c0_12] : memref<256x128xf32, #tpu.memory_space<vmem>>, vector<256x128xf32>
      tpu.vector_store %arg6[%c0_11, %c0_12], %12 {strides = array<i32>} : memref<256x128xf32, #tpu.memory_space<vmem>>, vector<256x128xf32>,
    } else {
    }
    %c0 = arith.constant 0 : index
    %c0_1 = arith.constant 0 : index
    %3 = vector.load %arg6[%c0, %c0_1] : memref<256x128xf32, #tpu.memory_space<vmem>>, vector<256x128xf32>
    %c0_2 = arith.constant 0 : index
    %c0_3 = arith.constant 0 : index
    %4 = vector.load %arg2[%c0_2, %c0_3] : memref<256x576xbf16, #tpu.memory_space<vmem>>, vector<256x576xbf16>
    %c0_4 = arith.constant 0 : index
    %c0_5 = arith.constant 0 : index
    %5 = vector.load %arg3[%c0_4, %c0_5] : memref<576x128xbf16, #tpu.memory_space<vmem>>, vector<576x128xbf16>
    %cst = arith.constant dense<0.000000e+00> : vector<256x128xf32>
    %6 = tpu.matmul %4, %5, %cst {dimension_numbers = #tpu.dot_dimension_numbers<[1], [0], [0], [1], [0, 0, 1, 1], [], []>} : vector<256x576xbf16>, vector<576x128xbf16>, vector<256x128xf32> -> vector<256x128xf32>
    %7 = arith.addf %3, %6 : vector<256x128xf32>
    %c0_6 = arith.constant 0 : index
    %c0_7 = arith.constant 0 : index
    %8 = vector.load %arg6[%c0_6, %c0_7] : memref<256x128xf32, #tpu.memory_space<vmem>>, vector<256x128xf32>
    tpu.vector_store %arg6[%c0_6, %c0_7], %7 {strides = array<i32>} : memref<256x128xf32, #tpu.memory_space<vmem>>, vector<256x128xf32>,
    %c0_i32_8 = arith.constant 0 : i32
    %9 = arith.cmpi eq, %arg1, %c0_i32_8 : i32
    %10 = arith.extui %9 : i1 to i32
    %c0_i32_9 = arith.constant 0 : i32
    %11 = arith.cmpi ne, %10, %c0_i32_9 : i32
    scf.if %11 {
      %c0_10 = arith.constant 0 : index
      %c0_11 = arith.constant 0 : index
      %12 = vector.load %arg6[%c0_10, %c0_11] : memref<256x128xf32, #tpu.memory_space<vmem>>, vector<256x128xf32>
      %c0_12 = arith.constant 0 : index
      %c0_13 = arith.constant 0 : index
      %13 = vector.load %arg4[%c0_12, %c0_13] : memref<1x128xf32, #tpu.memory_space<vmem>>, vector<1x128xf32>
      %14 = vector.broadcast %13 : vector<1x128xf32> to vector<256x128xf32>
      %15 = arith.addf %12, %14 : vector<256x128xf32>
      %cst_14 = arith.constant 0.000000e+00 : f32
      %16 = vector.broadcast %cst_14 : f32 to vector<256x128xf32>
      %17 = arith.maximumf %15, %16 : vector<256x128xf32>
      %c0_15 = arith.constant 0 : index
      %c0_16 = arith.constant 0 : index
      %18 = vector.load %arg5[%c0_15, %c0_16] : memref<256x128xf32, #tpu.memory_space<vmem>>, vector<256x128xf32>
      tpu.vector_store %arg5[%c0_15, %c0_16], %17 {strides = array<i32>} : memref<256x128xf32, #tpu.memory_space<vmem>>, vector<256x128xf32>,
    } else {
    }
    return
  }
  func.func @transform_0(%arg0: i32, %arg1: i32) -> (i32, i32) {
    %c0_i32 = arith.constant 0 : i32
    return %arg0, %arg1 : i32, i32
  }
  func.func @transform_1(%arg0: i32, %arg1: i32) -> (i32, i32) {
    %c0_i32 = arith.constant 0 : i32
    %c0_i32_0 = arith.constant 0 : i32
    return %arg1, %c0_i32 : i32, i32
  }
  func.func @transform_2(%arg0: i32, %arg1: i32) -> (i32, i32) {
    %c0_i32 = arith.constant 0 : i32
    %c0_i32_0 = arith.constant 0 : i32
    %c0_i32_1 = arith.constant 0 : i32
    return %c0_i32, %c0_i32_0 : i32, i32
  }
  func.func @transform_3(%arg0: i32, %arg1: i32) -> (i32, i32) {
    %c0_i32 = arith.constant 0 : i32
    %c0_i32_0 = arith.constant 0 : i32
    return %arg0, %c0_i32 : i32, i32
  }
}

module attributes {stable_mosaic.version = 11 : i64} {
  func.func @_conv_matmul_kernel(%arg0: i32, %arg1: i32, %arg2: memref<64x864xbf16, #tpu.memory_space<vmem>>, %arg3: memref<864x128xbf16, #tpu.memory_space<vmem>>, %arg4: memref<1x128xf32, #tpu.memory_space<vmem>>, %arg5: memref<64x128xf32, #tpu.memory_space<vmem>>, %arg6: memref<64x128xf32, #tpu.memory_space<vmem>>) attributes {dimension_semantics = [#tpu.dimension_semantics<parallel>, #tpu.dimension_semantics<arbitrary>], iteration_bounds = array<i64: 2, 1>, scalar_prefetch = 0 : i64, scratch_operands = 1 : i64, tpu.core_type = #tpu.core_type<tc>, window_params = [{transform_indices = @transform_0, window_bounds = array<i64: 64, 864>}, {transform_indices = @transform_1, window_bounds = array<i64: 864, 128>}, {pipeline_mode = #tpu.pipeline_mode<synchronous>, transform_indices = @transform_2, window_bounds = array<i64: 1, 128>}, {transform_indices = @transform_3, window_bounds = array<i64: 64, 128>}]} {
    %c0_i32 = arith.constant 0 : i32
    %0 = arith.cmpi eq, %arg1, %c0_i32 : i32
    %1 = arith.extui %0 : i1 to i32
    %c0_i32_0 = arith.constant 0 : i32
    %2 = arith.cmpi ne, %1, %c0_i32_0 : i32
    scf.if %2 {
      %cst_10 = arith.constant 0.000000e+00 : f32
      %12 = vector.broadcast %cst_10 : f32 to vector<64x128xf32>
      %c0_11 = arith.constant 0 : index
      %c0_12 = arith.constant 0 : index
      %13 = vector.load %arg6[%c0_11, %c0_12] : memref<64x128xf32, #tpu.memory_space<vmem>>, vector<64x128xf32>
      tpu.vector_store %arg6[%c0_11, %c0_12], %12 {strides = array<i32>} : memref<64x128xf32, #tpu.memory_space<vmem>>, vector<64x128xf32>,
    } else {
    }
    %c0 = arith.constant 0 : index
    %c0_1 = arith.constant 0 : index
    %3 = vector.load %arg6[%c0, %c0_1] : memref<64x128xf32, #tpu.memory_space<vmem>>, vector<64x128xf32>
    %c0_2 = arith.constant 0 : index
    %c0_3 = arith.constant 0 : index
    %4 = vector.load %arg2[%c0_2, %c0_3] : memref<64x864xbf16, #tpu.memory_space<vmem>>, vector<64x864xbf16>
    %c0_4 = arith.constant 0 : index
    %c0_5 = arith.constant 0 : index
    %5 = vector.load %arg3[%c0_4, %c0_5] : memref<864x128xbf16, #tpu.memory_space<vmem>>, vector<864x128xbf16>
    %cst = arith.constant dense<0.000000e+00> : vector<64x128xf32>
    %6 = tpu.matmul %4, %5, %cst {dimension_numbers = #tpu.dot_dimension_numbers<[1], [0], [0], [1], [0, 0, 1, 1], [], []>} : vector<64x864xbf16>, vector<864x128xbf16>, vector<64x128xf32> -> vector<64x128xf32>
    %7 = arith.addf %3, %6 : vector<64x128xf32>
    %c0_6 = arith.constant 0 : index
    %c0_7 = arith.constant 0 : index
    %8 = vector.load %arg6[%c0_6, %c0_7] : memref<64x128xf32, #tpu.memory_space<vmem>>, vector<64x128xf32>
    tpu.vector_store %arg6[%c0_6, %c0_7], %7 {strides = array<i32>} : memref<64x128xf32, #tpu.memory_space<vmem>>, vector<64x128xf32>,
    %c0_i32_8 = arith.constant 0 : i32
    %9 = arith.cmpi eq, %arg1, %c0_i32_8 : i32
    %10 = arith.extui %9 : i1 to i32
    %c0_i32_9 = arith.constant 0 : i32
    %11 = arith.cmpi ne, %10, %c0_i32_9 : i32
    scf.if %11 {
      %c0_10 = arith.constant 0 : index
      %c0_11 = arith.constant 0 : index
      %12 = vector.load %arg6[%c0_10, %c0_11] : memref<64x128xf32, #tpu.memory_space<vmem>>, vector<64x128xf32>
      %c0_12 = arith.constant 0 : index
      %c0_13 = arith.constant 0 : index
      %13 = vector.load %arg4[%c0_12, %c0_13] : memref<1x128xf32, #tpu.memory_space<vmem>>, vector<1x128xf32>
      %14 = vector.broadcast %13 : vector<1x128xf32> to vector<64x128xf32>
      %15 = arith.addf %12, %14 : vector<64x128xf32>
      %cst_14 = arith.constant 0.000000e+00 : f32
      %16 = vector.broadcast %cst_14 : f32 to vector<64x128xf32>
      %17 = arith.maximumf %15, %16 : vector<64x128xf32>
      %c0_15 = arith.constant 0 : index
      %c0_16 = arith.constant 0 : index
      %18 = vector.load %arg5[%c0_15, %c0_16] : memref<64x128xf32, #tpu.memory_space<vmem>>, vector<64x128xf32>
      tpu.vector_store %arg5[%c0_15, %c0_16], %17 {strides = array<i32>} : memref<64x128xf32, #tpu.memory_space<vmem>>, vector<64x128xf32>,
    } else {
    }
    return
  }
  func.func @transform_0(%arg0: i32, %arg1: i32) -> (i32, i32) {
    %c0_i32 = arith.constant 0 : i32
    return %arg0, %arg1 : i32, i32
  }
  func.func @transform_1(%arg0: i32, %arg1: i32) -> (i32, i32) {
    %c0_i32 = arith.constant 0 : i32
    %c0_i32_0 = arith.constant 0 : i32
    return %arg1, %c0_i32 : i32, i32
  }
  func.func @transform_2(%arg0: i32, %arg1: i32) -> (i32, i32) {
    %c0_i32 = arith.constant 0 : i32
    %c0_i32_0 = arith.constant 0 : i32
    %c0_i32_1 = arith.constant 0 : i32
    return %c0_i32, %c0_i32_0 : i32, i32
  }
  func.func @transform_3(%arg0: i32, %arg1: i32) -> (i32, i32) {
    %c0_i32 = arith.constant 0 : i32
    %c0_i32_0 = arith.constant 0 : i32
    return %arg0, %c0_i32 : i32, i32
  }
}

module attributes {stable_mosaic.version = 11 : i64} {
  func.func @_conv_matmul_kernel(%arg0: i32, %arg1: i32, %arg2: memref<64x36xbf16, #tpu.memory_space<vmem>>, %arg3: memref<36x384xbf16, #tpu.memory_space<vmem>>, %arg4: memref<1x384xf32, #tpu.memory_space<vmem>>, %arg5: memref<64x384xf32, #tpu.memory_space<vmem>>, %arg6: memref<64x384xf32, #tpu.memory_space<vmem>>) attributes {dimension_semantics = [#tpu.dimension_semantics<parallel>, #tpu.dimension_semantics<arbitrary>], iteration_bounds = array<i64: 2, 1>, scalar_prefetch = 0 : i64, scratch_operands = 1 : i64, tpu.core_type = #tpu.core_type<tc>, window_params = [{transform_indices = @transform_0, window_bounds = array<i64: 64, 36>}, {transform_indices = @transform_1, window_bounds = array<i64: 36, 384>}, {pipeline_mode = #tpu.pipeline_mode<synchronous>, transform_indices = @transform_2, window_bounds = array<i64: 1, 384>}, {transform_indices = @transform_3, window_bounds = array<i64: 64, 384>}]} {
    %c0_i32 = arith.constant 0 : i32
    %0 = arith.cmpi eq, %arg1, %c0_i32 : i32
    %1 = arith.extui %0 : i1 to i32
    %c0_i32_0 = arith.constant 0 : i32
    %2 = arith.cmpi ne, %1, %c0_i32_0 : i32
    scf.if %2 {
      %cst_10 = arith.constant 0.000000e+00 : f32
      %12 = vector.broadcast %cst_10 : f32 to vector<64x384xf32>
      %c0_11 = arith.constant 0 : index
      %c0_12 = arith.constant 0 : index
      %13 = vector.load %arg6[%c0_11, %c0_12] : memref<64x384xf32, #tpu.memory_space<vmem>>, vector<64x384xf32>
      tpu.vector_store %arg6[%c0_11, %c0_12], %12 {strides = array<i32>} : memref<64x384xf32, #tpu.memory_space<vmem>>, vector<64x384xf32>,
    } else {
    }
    %c0 = arith.constant 0 : index
    %c0_1 = arith.constant 0 : index
    %3 = vector.load %arg6[%c0, %c0_1] : memref<64x384xf32, #tpu.memory_space<vmem>>, vector<64x384xf32>
    %c0_2 = arith.constant 0 : index
    %c0_3 = arith.constant 0 : index
    %4 = vector.load %arg2[%c0_2, %c0_3] : memref<64x36xbf16, #tpu.memory_space<vmem>>, vector<64x36xbf16>
    %c0_4 = arith.constant 0 : index
    %c0_5 = arith.constant 0 : index
    %5 = vector.load %arg3[%c0_4, %c0_5] : memref<36x384xbf16, #tpu.memory_space<vmem>>, vector<36x384xbf16>
    %cst = arith.constant dense<0.000000e+00> : vector<64x384xf32>
    %6 = tpu.matmul %4, %5, %cst {dimension_numbers = #tpu.dot_dimension_numbers<[1], [0], [0], [1], [0, 0, 1, 1], [], []>} : vector<64x36xbf16>, vector<36x384xbf16>, vector<64x384xf32> -> vector<64x384xf32>
    %7 = arith.addf %3, %6 : vector<64x384xf32>
    %c0_6 = arith.constant 0 : index
    %c0_7 = arith.constant 0 : index
    %8 = vector.load %arg6[%c0_6, %c0_7] : memref<64x384xf32, #tpu.memory_space<vmem>>, vector<64x384xf32>
    tpu.vector_store %arg6[%c0_6, %c0_7], %7 {strides = array<i32>} : memref<64x384xf32, #tpu.memory_space<vmem>>, vector<64x384xf32>,
    %c0_i32_8 = arith.constant 0 : i32
    %9 = arith.cmpi eq, %arg1, %c0_i32_8 : i32
    %10 = arith.extui %9 : i1 to i32
    %c0_i32_9 = arith.constant 0 : i32
    %11 = arith.cmpi ne, %10, %c0_i32_9 : i32
    scf.if %11 {
      %c0_10 = arith.constant 0 : index
      %c0_11 = arith.constant 0 : index
      %12 = vector.load %arg6[%c0_10, %c0_11] : memref<64x384xf32, #tpu.memory_space<vmem>>, vector<64x384xf32>
      %c0_12 = arith.constant 0 : index
      %c0_13 = arith.constant 0 : index
      %13 = vector.load %arg4[%c0_12, %c0_13] : memref<1x384xf32, #tpu.memory_space<vmem>>, vector<1x384xf32>
      %14 = vector.broadcast %13 : vector<1x384xf32> to vector<64x384xf32>
      %15 = arith.addf %12, %14 : vector<64x384xf32>
      %cst_14 = arith.constant 0.000000e+00 : f32
      %16 = vector.broadcast %cst_14 : f32 to vector<64x384xf32>
      %17 = arith.maximumf %15, %16 : vector<64x384xf32>
      %c0_15 = arith.constant 0 : index
      %c0_16 = arith.constant 0 : index
      %18 = vector.load %arg5[%c0_15, %c0_16] : memref<64x384xf32, #tpu.memory_space<vmem>>, vector<64x384xf32>
      tpu.vector_store %arg5[%c0_15, %c0_16], %17 {strides = array<i32>} : memref<64x384xf32, #tpu.memory_space<vmem>>, vector<64x384xf32>,
    } else {
    }
    return
  }
  func.func @transform_0(%arg0: i32, %arg1: i32) -> (i32, i32) {
    %c0_i32 = arith.constant 0 : i32
    return %arg0, %arg1 : i32, i32
  }
  func.func @transform_1(%arg0: i32, %arg1: i32) -> (i32, i32) {
    %c0_i32 = arith.constant 0 : i32
    %c0_i32_0 = arith.constant 0 : i32
    return %arg1, %c0_i32 : i32, i32
  }
  func.func @transform_2(%arg0: i32, %arg1: i32) -> (i32, i32) {
    %c0_i32 = arith.constant 0 : i32
    %c0_i32_0 = arith.constant 0 : i32
    %c0_i32_1 = arith.constant 0 : i32
    return %c0_i32, %c0_i32_0 : i32, i32
  }
  func.func @transform_3(%arg0: i32, %arg1: i32) -> (i32, i32) {
    %c0_i32 = arith.constant 0 : i32
    %c0_i32_0 = arith.constant 0 : i32
    return %arg0, %c0_i32 : i32, i32
  }
}

module attributes {stable_mosaic.version = 11 : i64} {
  func.func @_maxpool_kernel(%arg0: i32, %arg1: i32, %arg2: memref<1x64x4xf32, #tpu.memory_space<vmem>>, %arg3: memref<64x4xf32, #tpu.memory_space<vmem>>) attributes {dimension_semantics = [#tpu.dimension_semantics<parallel>, #tpu.dimension_semantics<arbitrary>], iteration_bounds = array<i64: 2, 9>, scalar_prefetch = 0 : i64, scratch_operands = 0 : i64, tpu.core_type = #tpu.core_type<tc>, window_params = [{transform_indices = @transform_0, window_bounds = array<i64: 1, 64, 4>}, {transform_indices = @transform_1, window_bounds = array<i64: 64, 4>}]} {
    %c0_i32 = arith.constant 0 : i32
    %0 = arith.cmpi eq, %arg1, %c0_i32 : i32
    %1 = arith.extui %0 : i1 to i32
    %c0_i32_0 = arith.constant 0 : i32
    %2 = arith.cmpi ne, %1, %c0_i32_0 : i32
    scf.if %2 {
      %cst = arith.constant 0xFF800000 : f32
      %8 = vector.broadcast %cst : f32 to vector<64x4xf32>
      %c0_7 = arith.constant 0 : index
      %c0_8 = arith.constant 0 : index
      %9 = vector.load %arg3[%c0_7, %c0_8] : memref<64x4xf32, #tpu.memory_space<vmem>>, vector<64x4xf32>
      tpu.vector_store %arg3[%c0_7, %c0_8], %8 {strides = array<i32>} : memref<64x4xf32, #tpu.memory_space<vmem>>, vector<64x4xf32>,
    } else {
    }
    %c0 = arith.constant 0 : index
    %c0_1 = arith.constant 0 : index
    %3 = vector.load %arg3[%c0, %c0_1] : memref<64x4xf32, #tpu.memory_space<vmem>>, vector<64x4xf32>
    %c0_2 = arith.constant 0 : index
    %c0_3 = arith.constant 0 : index
    %c0_4 = arith.constant 0 : index
    %4 = vector.load %arg2[%c0_2, %c0_3, %c0_4] : memref<1x64x4xf32, #tpu.memory_space<vmem>>, vector<1x64x4xf32>
    %5 = vector.shape_cast %4 : vector<1x64x4xf32> to vector<64x4xf32>
    %6 = arith.maximumf %3, %5 : vector<64x4xf32>
    %c0_5 = arith.constant 0 : index
    %c0_6 = arith.constant 0 : index
    %7 = vector.load %arg3[%c0_5, %c0_6] : memref<64x4xf32, #tpu.memory_space<vmem>>, vector<64x4xf32>
    tpu.vector_store %arg3[%c0_5, %c0_6], %6 {strides = array<i32>} : memref<64x4xf32, #tpu.memory_space<vmem>>, vector<64x4xf32>,
    return
  }
  func.func @transform_0(%arg0: i32, %arg1: i32) -> (i32, i32, i32) {
    %c0_i32 = arith.constant 0 : i32
    %c0_i32_0 = arith.constant 0 : i32
    return %arg1, %arg0, %c0_i32 : i32, i32, i32
  }
  func.func @transform_1(%arg0: i32, %arg1: i32) -> (i32, i32) {
    %c0_i32 = arith.constant 0 : i32
    %c0_i32_0 = arith.constant 0 : i32
    return %arg0, %c0_i32 : i32, i32
  }
}

</mosaic_0001>

<bundles_post_ra>
// kernel: inception_b_forward.6
= control target key start
LH: loop header
LB: loop body
LE: loop exit
PB: predicated region body
PF: predicated region fallthrough
CT: control target
= control target key end

     0   :  { %s1079_s12 = smov 0   ;;  %s1081_s13 = smov 0   ;;  %s1224_s0 = inlined_call_operand.vmem [shape: bf16[512,4], index: 0, kind: input, shape index: {}]   ;;  %s1225_s1 = inlined_call_operand.vmem [shape: bf16[4,128], index: 1, kind: input, shape index: {}]   ;;  %s1226_s2 = inlined_call_operand.vmem [shape: f32[1,128], index: 2, kind: input, shape index: {}]   ;;  %s1227_s3 = inlined_call_operand.vmem [shape: f32[512,128], index: 3, kind: output, shape index: {}]  }
   0x1   :  { %s1083_s14 = smov 0  }
   0x2 LB: > { %s25_s15 = sadd.s32 1, %s1053_s13  ;;  %p900_p0 = scmp.ge.s32.totalorder %s1057_s14, 1  ;;  %s1057_s14 = sphi %s1083_s14, %s13_s14   ;;  %s1053_s13 = sphi %s1081_s13, %s1229_s13   ;;  %s1049_s12 = sphi %s1079_s12, %s1228_s12  }
   0x3   : > { %p27_p1 = scmp.ge.s32.totalorder %s25_s15, 2  ;;  %p164_p2 = scmp.lt.s32.totalorder %s1057_s14, 3 }
   0x5   : > { %s1231_s15 = smov (%p27_p1, %s25_s15), 0  ;;  %p165_p3 = pnand %p900_p0, %p164_p2 }
   0x6   : > { %v315_v0 = vld [vmem:[%s1225_s1] sm:$0x3] (!%p165_p3)  ;;  %vm445_vm0 = vcmask (!%p165_p3), 1041408   ;;  %s901_s18 = sshll.u32 (!%p165_p3), %s1049_s12, 5  ;;  %vm396_vm1 = vcmask (!%p165_p3), 31744  }
   0x7   : > { %168 = sbr.rel (%p165_p3) target bundleno = 264 (0x108), region = 32  ;;  %993 = vmatprep.subr.msk.bf16.mxu0 (!%p165_p3), %vm445_vm0, %v315_v0  ;;  %994 = vmatprep.subr.msk.bf16.mxu1 (!%p165_p3), %vm445_vm0, %v315_v0  ;;  %v447_v1 = vsel (!%p165_p3), %vm445_vm0, %v315_v0, 0  ;;  %p196_p4 = scmp.lt.s32.totalorder (!%p165_p3), %s901_s18, 63  ;;  %v1143_v18 = vld [vmem:[%s1226_s2] ss:$0 sm:$0xff] (!%p165_p3) }
   0x8   : > { %958 = vmatpush3.bf16.msra.mxu0 (!%p165_p3), %v447_v1  ;;  %992 = vmatpush3.bf16.msra.mxu1 (!%p165_p3), %v447_v1 }
   0xe   : > { %s1233_s18 = smov (!%p196_p4, %s901_s18), 63 }
   0xf   : > { %s902_s19 = sshll.u32 %s1233_s18, 2  ;;  %s904_s25 = sshll.u32 %s1233_s18, 3 }
  0x10   : > { %s1106_s22 = scalar_lea.vmem %s1224_s0, %s902_s19  ;;  %s1150_s28 = scalar_lea.vmem %s1227_s3, %s904_s25 }
  0x11   : > { %v1019_v2 = vld [vmem:[%s1106_s22] sm:$0xff]   ;;  %v1021_v4 = vld [vmem:[%s1106_s22 + $0x8] sm:$0xff]   ;;  %v1023_v6 = vld [vmem:[%s1106_s22 + $0x10] sm:$0xff]  }
  0x12   : > { %v1020_v3 = vld [vmem:[%s1106_s22 + $0x40] sm:$0xff]   ;;  %959 = vmatprep.mubr.msk.bf16.mxu0 %vm396_vm1, %v1019_v2  ;;  %v1022_v5 = vld [vmem:[%s1106_s22 + $0x48] sm:$0xff]   ;;  %v1024_v7 = vld [vmem:[%s1106_s22 + $0x50] sm:$0xff]  }
  0x13   : > { %975 = vmatprep.mubr.msk.bf16.mxu1 %vm396_vm1, %v1020_v3  ;;  %960 = vmatmul.mubr.msk.bf16.vlgmr.msra.gmra.mrb[0].mxu0 %vm396_vm1, %v1021_v4  ;;  %v1025_v8 = vld [vmem:[%s1106_s22 + $0x18] sm:$0xff]   ;;  %v1027_v10 = vld [vmem:[%s1106_s22 + $0x20] sm:$0xff]   ;;  %v1029_v12 = vld [vmem:[%s1106_s22 + $0x28] sm:$0xff]  }
  0x14   : > { %976 = vmatmul.mubr.msk.bf16.vlgmr.msra.gmra.mrb[0].mxu1 %vm396_vm1, %v1022_v5  ;;  %963 = vmatprep.mubr.msk.bf16.mxu0 %vm396_vm1, %v1023_v6  ;;  %v1026_v9 = vld [vmem:[%s1106_s22 + $0x58] sm:$0xff]   ;;  %v1028_v11 = vld [vmem:[%s1106_s22 + $0x60] sm:$0xff]   ;;  %v1030_v13 = vld [vmem:[%s1106_s22 + $0x68] sm:$0xff]  }
  0x15   : > { %979 = vmatprep.mubr.msk.bf16.mxu1 %vm396_vm1, %v1024_v7  ;;  %v1031_v14 = vld [vmem:[%s1106_s22 + $0x30] sm:$0xff]   ;;  %v1033_v16 = vld [vmem:[%s1106_s22 + $0x38] sm:$0xff]  }
  0x16   : > { %v1032_v15 = vld [vmem:[%s1106_s22 + $0x70] sm:$0xff]   ;;  %v1034_v17 = vld [vmem:[%s1106_s22 + $0x78] sm:$0xff]  }
  0x1b   : > { %964 = vmatmul.mubr.msk.bf16.gmra.mrb[4].mxu0 %vm396_vm1, %v1025_v8 }
  0x1c   : > { %980 = vmatmul.mubr.msk.bf16.gmra.mrb[4].mxu1 %vm396_vm1, %v1026_v9  ;;  %967 = vmatprep.mubr.msk.bf16.mxu0 %vm396_vm1, %v1027_v10 }
  0x1d   : > { %983 = vmatprep.mubr.msk.bf16.mxu1 %vm396_vm1, %v1028_v11 }
  0x23   : > { %968 = vmatmul.mubr.msk.bf16.gmra.mrb[8].mxu0 %vm396_vm1, %v1029_v12 }
  0x24   : > { %984 = vmatmul.mubr.msk.bf16.gmra.mrb[8].mxu1 %vm396_vm1, %v1030_v13  ;;  %971 = vmatprep.mubr.msk.bf16.mxu0 %vm396_vm1, %v1031_v14 }
  0x25   : > { %987 = vmatprep.mubr.msk.bf16.mxu1 %vm396_vm1, %v1032_v15 }
  0x2b   : > { %972 = vmatmul.mubr.msk.bf16.gmra.mrb[12].mxu0 %vm396_vm1, %v1033_v16 }
  0x2c   : > { %988 = vmatmul.mubr.msk.bf16.gmra.mrb[12].mxu1 %vm396_vm1, %v1034_v17 }
  0xe6   : > { %v961_v19 = vpop.f32.mrb[0].mxu0 }
  0xe7   : > { %v718_v20 = vadd.f32 %v961_v19, %v1143_v18  ;;  %v977_v21 = vpop.f32.mrb[0].mxu1  ;;  %v483_v22 = vpop.f32.mrb[1].mxu0 }
  0xe8   : > { %v734_v23 = vadd.f32 %v977_v21, %v1143_v18  ;;  %v716_v24 = vadd.f32 %v1143_v18, %v483_v22  ;;  %v547_v25 = vpop.f32.mrb[1].mxu1  ;;  %v962_v26 = vpop.f32.mrb[2].mxu0 }
  0xe9   : > { %v750_v27 = vmax.f32 %v718_v20, 0.0  ;;  %v732_v28 = vadd.f32 %v1143_v18, %v547_v25  ;;  %v719_v29 = vadd.f32 %v962_v26, %v1143_v18  ;;  %v978_v30 = vpop.f32.mrb[2].mxu1  ;;  %v486_v31 = vpop.f32.mrb[3].mxu0 }
  0xea   : > { %v766_v32 = vmax.f32 %v734_v23, 0.0  ;;  %v748_v33 = vmax.f32 %v716_v24, 0.0  ;;  %v735_v34 = vadd.f32 %v978_v30, %v1143_v18  ;;  %v717_v35 = vadd.f32 %v1143_v18, %v486_v31  ;;  %v550_v36 = vpop.f32.mrb[3].mxu1 }
  0xeb   : > { %782 = vst [vmem:[%s1150_s28 + $0x10] sm:$0xff] %v750_v27  ;;  %v764_v37 = vmax.f32 %v732_v28, 0.0  ;;  %v751_v38 = vmax.f32 %v719_v29, 0.0  ;;  %v733_v39 = vadd.f32 %v1143_v18, %v550_v36 }
  0xec   : > { %798 = vst [vmem:[%s1150_s28 + $0x90] sm:$0xff] %v766_v32  ;;  %780 = vst [vmem:[%s1150_s28] sm:$0xff] %v748_v33  ;;  %v767_v40 = vmax.f32 %v735_v34, 0.0  ;;  %v749_v41 = vmax.f32 %v717_v35, 0.0 }
  0xed   : > { %796 = vst [vmem:[%s1150_s28 + $0x80] sm:$0xff] %v764_v37  ;;  %783 = vst [vmem:[%s1150_s28 + $0x18] sm:$0xff] %v751_v38  ;;  %v765_v42 = vmax.f32 %v733_v39, 0.0 }
  0xee   : > { %799 = vst [vmem:[%s1150_s28 + $0x98] sm:$0xff] %v767_v40  ;;  %781 = vst [vmem:[%s1150_s28 + $0x8] sm:$0xff] %v749_v41  ;;  %v965_v43 = vpop.f32.mrb[4].mxu0 }
  0xef   : > { %797 = vst [vmem:[%s1150_s28 + $0x88] sm:$0xff] %v765_v42  ;;  %v722_v44 = vadd.f32 %v965_v43, %v1143_v18  ;;  %v981_v45 = vpop.f32.mrb[4].mxu1  ;;  %v499_v46 = vpop.f32.mrb[5].mxu0 }
  0xf0   : > { %v738_v47 = vadd.f32 %v981_v45, %v1143_v18  ;;  %v720_v48 = vadd.f32 %v1143_v18, %v499_v46  ;;  %v563_v49 = vpop.f32.mrb[5].mxu1  ;;  %v966_v50 = vpop.f32.mrb[6].mxu0 }
  0xf1   : > { %v754_v51 = vmax.f32 %v722_v44, 0.0  ;;  %v736_v52 = vadd.f32 %v1143_v18, %v563_v49  ;;  %v723_v53 = vadd.f32 %v966_v50, %v1143_v18  ;;  %v982_v54 = vpop.f32.mrb[6].mxu1  ;;  %v502_v55 = vpop.f32.mrb[7].mxu0 }
  0xf2   : > { %v770_v56 = vmax.f32 %v738_v47, 0.0  ;;  %v752_v57 = vmax.f32 %v720_v48, 0.0  ;;  %v739_v58 = vadd.f32 %v982_v54, %v1143_v18  ;;  %v721_v59 = vadd.f32 %v1143_v18, %v502_v55  ;;  %v566_v60 = vpop.f32.mrb[7].mxu1 }
  0xf3   : > { %786 = vst [vmem:[%s1150_s28 + $0x30] sm:$0xff] %v754_v51  ;;  %v768_v61 = vmax.f32 %v736_v52, 0.0  ;;  %v755_v62 = vmax.f32 %v723_v53, 0.0  ;;  %v737_v63 = vadd.f32 %v1143_v18, %v566_v60 }
  0xf4   : > { %802 = vst [vmem:[%s1150_s28 + $0xb0] sm:$0xff] %v770_v56  ;;  %784 = vst [vmem:[%s1150_s28 + $0x20] sm:$0xff] %v752_v57  ;;  %v771_v0 = vmax.f32 %v739_v58, 0.0  ;;  %v753_v1 = vmax.f32 %v721_v59, 0.0 }
  0xf5   : > { %800 = vst [vmem:[%s1150_s28 + $0xa0] sm:$0xff] %v768_v61  ;;  %787 = vst [vmem:[%s1150_s28 + $0x38] sm:$0xff] %v755_v62  ;;  %v769_v2 = vmax.f32 %v737_v63, 0.0 }
  0xf6   : > { %803 = vst [vmem:[%s1150_s28 + $0xb8] sm:$0xff] %v771_v0  ;;  %785 = vst [vmem:[%s1150_s28 + $0x28] sm:$0xff] %v753_v1  ;;  %v969_v3 = vpop.f32.mrb[8].mxu0 }
  0xf7   : > { %801 = vst [vmem:[%s1150_s28 + $0xa8] sm:$0xff] %v769_v2  ;;  %v726_v4 = vadd.f32 %v969_v3, %v1143_v18  ;;  %v985_v5 = vpop.f32.mrb[8].mxu1  ;;  %v515_v6 = vpop.f32.mrb[9].mxu0 }
  0xf8   : > { %v742_v7 = vadd.f32 %v985_v5, %v1143_v18  ;;  %v724_v8 = vadd.f32 %v1143_v18, %v515_v6  ;;  %v579_v9 = vpop.f32.mrb[9].mxu1  ;;  %v970_v10 = vpop.f32.mrb[10].mxu0 }
  0xf9   : > { %v758_v11 = vmax.f32 %v726_v4, 0.0  ;;  %v740_v12 = vadd.f32 %v1143_v18, %v579_v9  ;;  %v727_v13 = vadd.f32 %v970_v10, %v1143_v18  ;;  %v986_v14 = vpop.f32.mrb[10].mxu1  ;;  %v518_v15 = vpop.f32.mrb[11].mxu0 }
  0xfa   : > { %v774_v16 = vmax.f32 %v742_v7, 0.0  ;;  %v756_v17 = vmax.f32 %v724_v8, 0.0  ;;  %v743_v19 = vadd.f32 %v986_v14, %v1143_v18  ;;  %v725_v20 = vadd.f32 %v1143_v18, %v518_v15  ;;  %v582_v21 = vpop.f32.mrb[11].mxu1 }
  0xfb   : > { %790 = vst [vmem:[%s1150_s28 + $0x50] sm:$0xff] %v758_v11  ;;  %v772_v22 = vmax.f32 %v740_v12, 0.0  ;;  %v759_v23 = vmax.f32 %v727_v13, 0.0  ;;  %v741_v24 = vadd.f32 %v1143_v18, %v582_v21 }
  0xfc   : > { %806 = vst [vmem:[%s1150_s28 + $0xd0] sm:$0xff] %v774_v16  ;;  %788 = vst [vmem:[%s1150_s28 + $0x40] sm:$0xff] %v756_v17  ;;  %v775_v25 = vmax.f32 %v743_v19, 0.0  ;;  %v757_v26 = vmax.f32 %v725_v20, 0.0 }
  0xfd   : > { %804 = vst [vmem:[%s1150_s28 + $0xc0] sm:$0xff] %v772_v22  ;;  %791 = vst [vmem:[%s1150_s28 + $0x58] sm:$0xff] %v759_v23  ;;  %v773_v27 = vmax.f32 %v741_v24, 0.0 }
  0xfe   : > { %807 = vst [vmem:[%s1150_s28 + $0xd8] sm:$0xff] %v775_v25  ;;  %789 = vst [vmem:[%s1150_s28 + $0x48] sm:$0xff] %v757_v26  ;;  %v973_v28 = vpop.f32.mrb[12].mxu0 }
  0xff   : > { %805 = vst [vmem:[%s1150_s28 + $0xc8] sm:$0xff] %v773_v27  ;;  %v730_v29 = vadd.f32 %v973_v28, %v1143_v18  ;;  %v989_v30 = vpop.f32.mrb[12].mxu1  ;;  %v531_v31 = vpop.f32.mrb[13].mxu0 }
 0x100   : > { %v746_v32 = vadd.f32 %v989_v30, %v1143_v18  ;;  %v728_v33 = vadd.f32 %v1143_v18, %v531_v31  ;;  %v595_v34 = vpop.f32.mrb[13].mxu1  ;;  %v974_v35 = vpop.f32.mrb[14].mxu0 }
 0x101   : > { %v762_v36 = vmax.f32 %v730_v29, 0.0  ;;  %v744_v37 = vadd.f32 %v1143_v18, %v595_v34  ;;  %v731_v38 = vadd.f32 %v974_v35, %v1143_v18  ;;  %v990_v39 = vpop.f32.mrb[14].mxu1  ;;  %v534_v40 = vpop.f32.mrb[15].mxu0 }
 0x102   : > { %v778_v41 = vmax.f32 %v746_v32, 0.0  ;;  %v760_v42 = vmax.f32 %v728_v33, 0.0  ;;  %v747_v43 = vadd.f32 %v990_v39, %v1143_v18  ;;  %v729_v44 = vadd.f32 %v1143_v18, %v534_v40  ;;  %v598_v45 = vpop.f32.mrb[15].mxu1 }
 0x103   : > { %794 = vst [vmem:[%s1150_s28 + $0x70] sm:$0xff] %v762_v36  ;;  %v776_v46 = vmax.f32 %v744_v37, 0.0  ;;  %v763_v47 = vmax.f32 %v731_v38, 0.0  ;;  %v745_v48 = vadd.f32 %v1143_v18, %v598_v45 }
 0x104   : > { %810 = vst [vmem:[%s1150_s28 + $0xf0] sm:$0xff] %v778_v41  ;;  %792 = vst [vmem:[%s1150_s28 + $0x60] sm:$0xff] %v760_v42  ;;  %v779_v49 = vmax.f32 %v747_v43, 0.0  ;;  %v761_v50 = vmax.f32 %v729_v44, 0.0 }
 0x105   : > { %808 = vst [vmem:[%s1150_s28 + $0xe0] sm:$0xff] %v776_v46  ;;  %795 = vst [vmem:[%s1150_s28 + $0x78] sm:$0xff] %v763_v47  ;;  %v777_v51 = vmax.f32 %v745_v48, 0.0 }
 0x106   : > { %811 = vst [vmem:[%s1150_s28 + $0xf8] sm:$0xff] %v779_v49  ;;  %793 = vst [vmem:[%s1150_s28 + $0x68] sm:$0xff] %v761_v50 }
 0x107   : > { %809 = vst [vmem:[%s1150_s28 + $0xe8] sm:$0xff] %v777_v51 }
 0x108 PF: > { %s13_s14 = sadd.s32 1, %s1057_s14   ;;  %s1228_s12 = smov %s1053_s13 }
 0x109   : > { %p10_p5 = scmp.ge.s32.totalorder %s13_s14, 4   ;;  %s1229_s13 = smov %s1231_s15 }
 0x10b   :  { %12 = sbr.rel (!%p10_p5) target bundleno = 2 (0x2), region = 73 }

// kernel: inception_b_forward.7
= control target key start
LH: loop header
LB: loop body
LE: loop exit
PB: predicated region body
PF: predicated region fallthrough
CT: control target
= control target key end

     0   :  { %s2562_s12 = smov 0   ;;  %s2564_s13 = smov 0   ;;  %s2990_s0 = inlined_call_operand.vmem [shape: bf16[512,576], index: 0, kind: input, shape index: {}]   ;;  %s2991_s1 = inlined_call_operand.vmem [shape: bf16[576,128], index: 1, kind: input, shape index: {}]   ;;  %s2992_s2 = inlined_call_operand.vmem [shape: f32[1,128], index: 2, kind: input, shape index: {}]   ;;  %s2993_s3 = inlined_call_operand.vmem [shape: f32[512,128], index: 3, kind: output, shape index: {}]  }
   0x1   :  { %s2566_s14 = smov 0  }
   0x2 LB: > { %s25_s15 = sadd.s32 1, %s2536_s13  ;;  %p1905_p0 = scmp.ge.s32.totalorder %s2540_s14, 1  ;;  %s2540_s14 = sphi %s2566_s14, %s13_s14   ;;  %s2536_s13 = sphi %s2564_s13, %s2995_s13   ;;  %s2532_s12 = sphi %s2562_s12, %s2994_s12  }
   0x3   : > { %p27_p1 = scmp.ge.s32.totalorder %s25_s15, 2  ;;  %p169_p2 = scmp.lt.s32.totalorder %s2540_s14, 3 }
   0x5   : > { %s2997_s15 = smov (%p27_p1, %s25_s15), 0  ;;  %p170_p3 = pnand %p1905_p0, %p169_p2 }
   0x6   : > { %v2370_v0 = vld [vmem:[%s2991_s1 + $0x40] sm:$0xff] (!%p170_p3)   ;;  %s1906_s18 = sshll.u32 (!%p170_p3), %s2532_s12, 5  ;;  %v2372_v2 = vld [vmem:[%s2991_s1 + $0x48] sm:$0xff] (!%p170_p3)   ;;  %v2374_v4 = vld [vmem:[%s2991_s1 + $0x50] sm:$0xff] (!%p170_p3)   ;;  %vm1080_vm0 = vcmask (!%p170_p3), 523264  }
   0x7   : > { %173 = sbr.rel (%p170_p3) target bundleno = 417 (0x1a1), region = 32  ;;  %v2371_v1 = vld [vmem:[%s2991_s1] sm:$0xff] (!%p170_p3)   ;;  %2045 = vmatprep.subr.bf16.mxu0 (!%p170_p3), %v2370_v0  ;;  %2329 = vmatprep.subr.bf16.mxu1 (!%p170_p3), %v2370_v0  ;;  %p205_p4 = scmp.lt.s32.totalorder (!%p170_p3), %s1906_s18, 63  ;;  %v2373_v3 = vld [vmem:[%s2991_s1 + $0x8] sm:$0xff] (!%p170_p3)   ;;  %v2375_v5 = vld [vmem:[%s2991_s1 + $0x10] sm:$0xff] (!%p170_p3)  }
   0x8   : > { %2046 = vmatpush3.bf16.msra.mxu0 (!%p170_p3), %v2371_v1  ;;  %2337 = vmatpush3.bf16.msra.mxu1 (!%p170_p3), %v2371_v1  ;;  %v2376_v6 = vld [vmem:[%s2991_s1 + $0x58] sm:$0xff] (!%p170_p3)   ;;  %v2378_v8 = vld [vmem:[%s2991_s1 + $0x60] sm:$0xff] (!%p170_p3)   ;;  %v2380_v10 = vld [vmem:[%s2991_s1 + $0x68] sm:$0xff] (!%p170_p3)  }
   0x9   : > { %2047 = vmatprep.subr.bf16.mxu0 (!%p170_p3), %v2372_v2  ;;  %2330 = vmatprep.subr.bf16.mxu1 (!%p170_p3), %v2372_v2  ;;  %v2377_v7 = vld [vmem:[%s2991_s1 + $0x18] sm:$0xff] (!%p170_p3)   ;;  %v2379_v9 = vld [vmem:[%s2991_s1 + $0x20] sm:$0xff] (!%p170_p3)   ;;  %v2381_v13 = vld [vmem:[%s2991_s1 + $0x28] sm:$0xff] (!%p170_p3)  }
   0xa   : > { %v2382_v14 = vld [vmem:[%s2991_s1 + $0x70] sm:$0xff] (!%p170_p3)   ;;  %v2384_v16 = vld [vmem:[%s2991_s1 + $0x78] sm:$0xff] (!%p170_p3)   ;;  %v2392_v18 = vld [vmem:[%s2991_s1 + $0xc0] sm:$0xff] (!%p170_p3)  }
   0xb   : > { %v2383_v15 = vld [vmem:[%s2991_s1 + $0x30] sm:$0xff] (!%p170_p3)   ;;  %v2385_v17 = vld [vmem:[%s2991_s1 + $0x38] sm:$0xff] (!%p170_p3)   ;;  %v2395_v19 = vld [vmem:[%s2991_s1 + $0x100] sm:$0xff] (!%p170_p3)  }
   0xc   : > { %2048 = vmatpush3.bf16.msra.mxu0 (!%p170_p3), %v2373_v3  ;;  %2338 = vmatpush3.bf16.msra.mxu1 (!%p170_p3), %v2373_v3  ;;  %v2393_v22 = vld [vmem:[%s2991_s1 + $0x80] sm:$0xff] (!%p170_p3)   ;;  %v2394_v23 = vld [vmem:[%s2991_s1 + $0xc8] sm:$0xff] (!%p170_p3)   ;;  %v2403_v28 = vld [vmem:[%s2991_s1 + $0xd0] sm:$0xff] (!%p170_p3)  }
   0xd   : > { %2049 = vmatprep.subr.bf16.mxu0 (!%p170_p3), %v2374_v4  ;;  %2331 = vmatprep.subr.bf16.mxu1 (!%p170_p3), %v2374_v4  ;;  %v2396_v26 = vld [vmem:[%s2991_s1 + $0x88] sm:$0xff] (!%p170_p3)   ;;  %v2404_v30 = vld [vmem:[%s2991_s1 + $0x90] sm:$0xff] (!%p170_p3)   ;;  %v2405_v31 = vld [vmem:[%s2991_s1 + $0xd8] sm:$0xff] (!%p170_p3)  }
   0xe   : > { %s2999_s18 = smov (!%p205_p4, %s1906_s18), 63  ;;  %v2406_v34 = vld [vmem:[%s2991_s1 + $0x98] sm:$0xff]   ;;  %v2426_v35 = vld [vmem:[%s2991_s1 + $0x108] sm:$0xff]   ;;  %v2413_v37 = vld [vmem:[%s2991_s1 + $0xe0] sm:$0xff]  }
   0xf   : > { %s2345_s4 = smul.u32 20, %s2999_s18  ;;  %v2414_v39 = vld [vmem:[%s2991_s1 + $0xa0] sm:$0xff]   ;;  %v2415_v40 = vld [vmem:[%s2991_s1 + $0xe8] sm:$0xff]   ;;  %v2423_v46 = vld [vmem:[%s2991_s1 + $0xf0] sm:$0xff]   ;;  %s1909_s27 = sshll.u32 %s2999_s18, 3 }
  0x10   : > { %2050 = vmatpush3.bf16.msra.mxu0 %v2375_v5  ;;  %2339 = vmatpush3.bf16.msra.mxu1 %v2375_v5  ;;  %v2416_v43 = vld [vmem:[%s2991_s1 + $0xa8] sm:$0xff]   ;;  %v2446_v47 = vld [vmem:[%s2991_s1 + $0x110] sm:$0xff]   ;;  %v2425_v49 = vld [vmem:[%s2991_s1 + $0xf8] sm:$0xff]   ;;  %s2869_s30 = scalar_lea.vmem %s2993_s3, %s1909_s27 }
  0x11   : > { %2051 = vmatprep.subr.bf16.mxu0 %v2376_v6  ;;  %2332 = vmatprep.subr.bf16.mxu1 %v2376_v6  ;;  %s2613_s11 = scalar_lea.vmem %s2990_s0, %s2345_s4  ;;  %v2424_v48 = vld [vmem:[%s2991_s1 + $0xb0] sm:$0xff]   ;;  %v2427_v52 = vld [vmem:[%s2991_s1 + $0xb8] sm:$0xff]  }
  0x12   : > { %v2388_v11 = vld [vmem:[%s2613_s11 + $0x4] ss:$20 sps:$4 sm:$0xff]   ;;  %v2386_v20 = vld [vmem:[%s2613_s11] ss:$20 sps:$4 sm:$0xff]   ;;  %v2401_v27 = vld [vmem:[%s2613_s11 + $0x28] ss:$20 sps:$4 sm:$0xff]  }
  0x13   : > { %v2391_v12 = vld [vmem:[%s2613_s11 + $0x1e4] ss:$20 sps:$4 sm:$0xff]   ;;  %1161 = vmatprep.mubr.bf16.mxu0 %v2388_v11  ;;  %v2389_v21 = vld [vmem:[%s2613_s11 + $0x1e0] ss:$20 sps:$4 sm:$0xff]   ;;  %v2402_v29 = vld [vmem:[%s2613_s11 + $0x208] ss:$20 sps:$4 sm:$0xff]  }
  0x14   : > { %2052 = vmatpush3.bf16.msra.mxu0 %v2377_v7  ;;  %2340 = vmatpush3.bf16.msra.mxu1 %v2377_v7  ;;  %v2397_v24 = vld [vmem:[%s2613_s11 + $0x2c] ss:$20 sps:$4 sm:$0xff]   ;;  %v2407_v32 = vld [vmem:[%s2613_s11 + $0x54] ss:$20 sps:$4 sm:$0xff]   ;;  %v2411_v36 = vld [vmem:[%s2613_s11 + $0x50] ss:$20 sps:$4 sm:$0xff]  }
  0x15   : > { %2053 = vmatprep.subr.bf16.mxu0 %v2378_v8  ;;  %2333 = vmatprep.subr.bf16.mxu1 %v2378_v8  ;;  %v2399_v25 = vld [vmem:[%s2613_s11 + $0x20c] ss:$20 sps:$4 sm:$0xff]   ;;  %v2409_v33 = vld [vmem:[%s2613_s11 + $0x234] ss:$20 sps:$4 sm:$0xff]   ;;  %v2412_v38 = vld [vmem:[%s2613_s11 + $0x230] ss:$20 sps:$4 sm:$0xff]  }
  0x16   : > { %1257 = vmatprep.mubr.bf16.mxu1 %v2391_v12  ;;  %v2417_v41 = vld [vmem:[%s2613_s11 + $0x7c] ss:$20 sps:$4 sm:$0xff]   ;;  %v2421_v44 = vld [vmem:[%s2613_s11 + $0x78] ss:$20 sps:$4 sm:$0xff]   ;;  %v2433_v54 = vld [vmem:[%s2613_s11 + $0xa0] ss:$20 sps:$4 sm:$0xff]  }
  0x17   : > { %v2419_v42 = vld [vmem:[%s2613_s11 + $0x25c] ss:$20 sps:$4 sm:$0xff]   ;;  %v2422_v45 = vld [vmem:[%s2613_s11 + $0x258] ss:$20 sps:$4 sm:$0xff]   ;;  %v2436_v57 = vld [vmem:[%s2613_s11 + $0x34] ss:$20 sps:$4 sm:$0xff]  }
  0x18   : > { %2054 = vmatpush3.bf16.msra.mxu0 %v2379_v9  ;;  %2341 = vmatpush3.bf16.msra.mxu1 %v2379_v9  ;;  %v2428_v50 = vld [vmem:[%s2613_s11 + $0xa4] ss:$20 sps:$4 sm:$0xff]   ;;  %v2432_v51 = vld [vmem:[%s2613_s11 + $0xc] ss:$20 sps:$4 sm:$0xff]   ;;  %v2430_v53 = vld [vmem:[%s2613_s11 + $0x8] ss:$20 sps:$4 sm:$0xff]  }
  0x19   : > { %2055 = vmatprep.subr.bf16.mxu0 %v2380_v10  ;;  %2334 = vmatprep.subr.bf16.mxu1 %v2380_v10  ;;  %v2434_v55 = vld [vmem:[%s2613_s11 + $0xcc] ss:$20 sps:$4 sm:$0xff]   ;;  %v2465_v56 = vld [vmem:[%s2991_s1 + $0x118] sm:$0xff]   ;;  %v2439_v59 = vld [vmem:[%s2613_s11 + $0x30] ss:$20 sps:$4 sm:$0xff]  }
  0x1a   : > { %v2438_v58 = vld [vmem:[%s2613_s11 + $0xc8] ss:$20 sps:$4 sm:$0xff]   ;;  %v2444_v62 = vld [vmem:[%s2613_s11 + $0xf0] ss:$20 sps:$4 sm:$0xff]   ;;  %v2445_v63 = vld [vmem:[%s2613_s11 + $0x58] ss:$20 sps:$4 sm:$0xff]  }
  0x1b   : > { %v2440_v60 = vld [vmem:[%s2613_s11 + $0xf4] ss:$20 sps:$4 sm:$0xff]   ;;  %v2442_v61 = vld [vmem:[%s2613_s11 + $0x5c] ss:$20 sps:$4 sm:$0xff]   ;;  %v2449_v1 = vld [vmem:[%s2613_s11 + $0x84] ss:$20 sps:$4 sm:$0xff]  }
  0x1c   : > { %2056 = vmatpush3.bf16.msra.mxu0 %v2381_v13  ;;  %2342 = vmatpush3.bf16.msra.mxu1 %v2381_v13  ;;  %v2447_v0 = vld [vmem:[%s2613_s11 + $0x11c] ss:$20 sps:$4 sm:$0xff]   ;;  %v2451_v2 = vld [vmem:[%s2613_s11 + $0x118] ss:$20 sps:$4 sm:$0xff]   ;;  %v2452_v3 = vld [vmem:[%s2613_s11 + $0x80] ss:$20 sps:$4 sm:$0xff]  }
  0x1d   : > { %2057 = vmatprep.subr.bf16.mxu0 %v2382_v14  ;;  %2335 = vmatprep.subr.bf16.mxu1 %v2382_v14  ;;  %v2453_v4 = vld [vmem:[%s2613_s11 + $0x144] ss:$20 sps:$4 sm:$0xff]   ;;  %v2455_v5 = vld [vmem:[%s2613_s11 + $0xac] ss:$20 sps:$4 sm:$0xff]   ;;  %v2458_v7 = vld [vmem:[%s2613_s11 + $0xa8] ss:$20 sps:$4 sm:$0xff]  }
  0x1e   : > { %v2457_v6 = vld [vmem:[%s2613_s11 + $0x140] ss:$20 sps:$4 sm:$0xff]   ;;  %v2463_v10 = vld [vmem:[%s2613_s11 + $0x168] ss:$20 sps:$4 sm:$0xff]   ;;  %v2464_v11 = vld [vmem:[%s2613_s11 + $0xd0] ss:$20 sps:$4 sm:$0xff]  }
  0x1f   : > { %v2459_v8 = vld [vmem:[%s2613_s11 + $0x16c] ss:$20 sps:$4 sm:$0xff]   ;;  %v2461_v9 = vld [vmem:[%s2613_s11 + $0xd4] ss:$20 sps:$4 sm:$0xff]   ;;  %v2468_v13 = vld [vmem:[%s2613_s11 + $0xfc] ss:$20 sps:$4 sm:$0xff]  }
  0x20   : > { %2058 = vmatpush3.bf16.msra.mxu0 %v2383_v15  ;;  %2343 = vmatpush3.bf16.msra.mxu1 %v2383_v15  ;;  %v2466_v12 = vld [vmem:[%s2613_s11 + $0x194] ss:$20 sps:$4 sm:$0xff]   ;;  %v2470_v14 = vld [vmem:[%s2613_s11 + $0x190] ss:$20 sps:$4 sm:$0xff]   ;;  %v2471_v15 = vld [vmem:[%s2613_s11 + $0xf8] ss:$20 sps:$4 sm:$0xff]  }
  0x21   : > { %2059 = vmatprep.subr.bf16.mxu0 %v2384_v16  ;;  %2336 = vmatprep.subr.bf16.mxu1 %v2384_v16  ;;  %v2472_v16 = vld [vmem:[%s2613_s11 + $0x1bc] ss:$20 sps:$4 sm:$0xff]  }
  0x24   : > { %2060 = vmatpush3.bf16.msra.mxu0 %v2385_v17  ;;  %2344 = vmatpush3.bf16.msra.mxu1 %v2385_v17  ;;  %v2474_v17 = vld [vmem:[%s2613_s11 + $0x124] ss:$20 sps:$4 sm:$0xff]  }
  0x25   : > { %2157 = vmatprep.subr.bf16.mxu1 %v2392_v18  ;;  %2289 = vmatprep.subr.bf16.mxu0 %v2395_v19  ;;  %v2476_v18 = vld [vmem:[%s2613_s11 + $0x1b8] ss:$20 sps:$4 sm:$0xff]  }
  0x27   : > { %1162 = vmatmul.mubr.bf16.vlgmr.msra.gmra.mrb[0].mxu0 %v2386_v20  ;;  %1258 = vmatmul.mubr.bf16.vlgmr.msra.gmra.mrb[0].mxu1 %v2389_v21  ;;  %v2478_v20 = vld [vmem:[%s2613_s11 + $0x14c] ss:$20 sps:$4 sm:$0xff]   ;;  %v2480_v21 = vld [vmem:[%s2613_s11 + $0x10] ss:$20 sps:$4 sm:$0xff]  }
  0x28   : > { %2158 = vmatpush3.bf16.msra.mxu1 %v2393_v22  ;;  %2290 = vmatpush3.bf16.msra.mxu0 %v2395_v19  ;;  %v2477_v19 = vld [vmem:[%s2613_s11 + $0x120] ss:$20 sps:$4 sm:$0xff]   ;;  %v2481_v22 = vld [vmem:[%s2613_s11 + $0x148] ss:$20 sps:$4 sm:$0xff]  }
  0x29   : > { %2159 = vmatprep.subr.bf16.mxu1 %v2394_v23  ;;  %1169 = vmatprep.mubr.bf16.mxu0 %v2397_v24  ;;  %v2482_v23 = vld [vmem:[%s2613_s11 + $0x38] ss:$20 sps:$4 sm:$0xff]   ;;  %v2483_v24 = vld [vmem:[%s2613_s11 + $0x174] ss:$20 sps:$4 sm:$0xff]  }
  0x2a   : > { %1265 = vmatprep.mubr.bf16.mxu1 %v2399_v25  ;;  %2291 = vmatprep.subr.bf16.mxu0 %v2426_v35  ;;  %v2485_v25 = vld [vmem:[%s2613_s11 + $0x60] ss:$20 sps:$4 sm:$0xff]  }
  0x2c   : > { %2160 = vmatpush3.bf16.msra.mxu1 %v2396_v26  ;;  %2292 = vmatpush3.bf16.msra.mxu0 %v2426_v35  ;;  %v2486_v26 = vld [vmem:[%s2613_s11 + $0x170] ss:$20 sps:$4 sm:$0xff]   ;;  %v2497_v35 = vld [vmem:[%s2613_s11 + $0x128] ss:$20 sps:$4 sm:$0xff]  }
  0x2d   : > { %2161 = vmatprep.subr.bf16.mxu1 %v2403_v28  ;;  %2293 = vmatprep.subr.bf16.mxu0 %v2446_v47  ;;  %v2488_v28 = vld [vmem:[%s2613_s11 + $0x19c] ss:$20 sps:$4 sm:$0xff]  }
  0x2f   : > { %1170 = vmatmul.mubr.bf16.gmra.mrb[4].mxu0 %v2401_v27  ;;  %1266 = vmatmul.mubr.bf16.gmra.mrb[4].mxu1 %v2402_v29  ;;  %v2487_v27 = vld [vmem:[%s2613_s11 + $0x88] ss:$20 sps:$4 sm:$0xff]   ;;  %v2490_v29 = vld [vmem:[%s2613_s11 + $0xb0] ss:$20 sps:$4 sm:$0xff]  }
  0x30   : > { %2162 = vmatpush3.bf16.msra.mxu1 %v2404_v30  ;;  %1177 = vmatprep.mubr.bf16.mxu0 %v2407_v32  ;;  %v2491_v30 = vld [vmem:[%s2613_s11 + $0x198] ss:$20 sps:$4 sm:$0xff]  }
  0x31   : > { %2163 = vmatprep.subr.bf16.mxu1 %v2405_v31  ;;  %1273 = vmatprep.mubr.bf16.mxu1 %v2409_v33  ;;  %v2492_v31 = vld [vmem:[%s2613_s11 + $0xd8] ss:$20 sps:$4 sm:$0xff]   ;;  %v2495_v33 = vld [vmem:[%s2613_s11 + $0x100] ss:$20 sps:$4 sm:$0xff]  }
  0x32   : > { %2294 = vmatpush3.bf16.msra.mxu0 %v2446_v47  ;;  %v2493_v32 = vld [vmem:[%s2613_s11 + $0x1c4] ss:$20 sps:$4 sm:$0xff]  }
  0x33   : > { %2295 = vmatprep.subr.bf16.mxu0 %v2465_v56  ;;  %v2512_v47 = vld [vmem:[%s2613_s11 + $0x218] ss:$20 sps:$4 sm:$0xff]  }
  0x34   : > { %2164 = vmatpush3.bf16.msra.mxu1 %v2406_v34  ;;  %v2496_v34 = vld [vmem:[%s2613_s11 + $0x1c0] ss:$20 sps:$4 sm:$0xff]  }
  0x35   : > { %2165 = vmatprep.subr.bf16.mxu1 %v2413_v37  ;;  %v2500_v37 = vld [vmem:[%s2613_s11 + $0x150] ss:$20 sps:$4 sm:$0xff]  }
  0x36   : > { %2296 = vmatpush3.bf16.msra.mxu0 %v2465_v56 }
  0x37   : > { %1178 = vmatmul.mubr.bf16.gmra.mrb[8].mxu0 %v2411_v36  ;;  %1274 = vmatmul.mubr.bf16.gmra.mrb[8].mxu1 %v2412_v38  ;;  %v2498_v36 = vld [vmem:[%s2613_s11 + $0x1ec] ss:$20 sps:$4 sm:$0xff]   ;;  %v2501_v38 = vld [vmem:[%s2613_s11 + $0x1e8] ss:$20 sps:$4 sm:$0xff]  }
  0x38   : > { %2166 = vmatpush3.bf16.msra.mxu1 %v2414_v39  ;;  %1185 = vmatprep.mubr.bf16.mxu0 %v2417_v41  ;;  %v2502_v39 = vld [vmem:[%s2613_s11 + $0x178] ss:$20 sps:$4 sm:$0xff]   ;;  %v2505_v41 = vld [vmem:[%s2613_s11 + $0x1a0] ss:$20 sps:$4 sm:$0xff]  }
  0x39   : > { %2167 = vmatprep.subr.bf16.mxu1 %v2415_v40  ;;  %1281 = vmatprep.mubr.bf16.mxu1 %v2419_v42  ;;  %v2503_v40 = vld [vmem:[%s2613_s11 + $0x214] ss:$20 sps:$4 sm:$0xff]   ;;  %v2506_v42 = vld [vmem:[%s2613_s11 + $0x210] ss:$20 sps:$4 sm:$0xff]  }
  0x3c   : > { %2168 = vmatpush3.bf16.msra.mxu1 %v2416_v43  ;;  %v2507_v43 = vld [vmem:[%s2613_s11 + $0x1c8] ss:$20 sps:$4 sm:$0xff]  }
  0x3d   : > { %2169 = vmatprep.subr.bf16.mxu1 %v2423_v46  ;;  %v2511_v46 = vld [vmem:[%s2613_s11 + $0x238] ss:$20 sps:$4 sm:$0xff]  }
  0x3f   : > { %1186 = vmatmul.mubr.bf16.gmra.mrb[12].mxu0 %v2421_v44  ;;  %1282 = vmatmul.mubr.bf16.gmra.mrb[12].mxu1 %v2422_v45  ;;  %v2508_v44 = vld [vmem:[%s2613_s11 + $0x23c] ss:$20 sps:$4 sm:$0xff]  }
  0x40   : > { %2170 = vmatpush3.bf16.msra.mxu1 %v2424_v48  ;;  %1193 = vmatprep.mubr.bf16.mxu0 %v2428_v50  ;;  %v2510_v45 = vld [vmem:[%s2613_s11 + $0x1f0] ss:$20 sps:$4 sm:$0xff]   ;;  %v2516_v50 = vld [vmem:[%s2613_s11 + $0x260] ss:$20 sps:$4 sm:$0xff]  }
  0x41   : > { %2171 = vmatprep.subr.bf16.mxu1 %v2425_v49  ;;  %1322 = vmatprep.mubr.bf16.mxu1 %v2432_v51  ;;  %v2513_v48 = vld [vmem:[%s2613_s11 + $0x264] ss:$20 sps:$4 sm:$0xff]   ;;  %v2515_v49 = vld [vmem:[%s2613_s11 + $0x240] ss:$20 sps:$4 sm:$0xff]   ;;  %v2517_v51 = vld [vmem:[%s2613_s11 + $0x268] ss:$20 sps:$4 sm:$0xff]  }
  0x44   : > { %2172 = vmatpush3.bf16.msra.mxu1 %v2427_v52 }
  0x47   : > { %1194 = vmatmul.mubr.bf16.gmra.mrb[16].mxu0 %v2433_v54  ;;  %1323 = vmatmul.mubr.bf16.vlgmr.msra.gmra.mrb[16].mxu1 %v2430_v53 }
  0x48   : > { %1201 = vmatprep.mubr.bf16.mxu0 %v2434_v55  ;;  %1330 = vmatprep.mubr.bf16.mxu1 %v2436_v57 }
  0x4f   : > { %1202 = vmatmul.mubr.bf16.gmra.mrb[20].mxu0 %v2438_v58  ;;  %1331 = vmatmul.mubr.bf16.gmra.mrb[20].mxu1 %v2439_v59 }
  0x50   : > { %1209 = vmatprep.mubr.bf16.mxu0 %v2440_v60  ;;  %1338 = vmatprep.mubr.bf16.mxu1 %v2442_v61 }
  0x57   : > { %1210 = vmatmul.mubr.bf16.gmra.mrb[24].mxu0 %v2444_v62  ;;  %1339 = vmatmul.mubr.bf16.gmra.mrb[24].mxu1 %v2445_v63 }
  0x58   : > { %1217 = vmatprep.mubr.bf16.mxu0 %v2447_v0  ;;  %1346 = vmatprep.mubr.bf16.mxu1 %v2449_v1 }
  0x5f   : > { %1218 = vmatmul.mubr.bf16.gmra.mrb[28].mxu0 %v2451_v2  ;;  %1347 = vmatmul.mubr.bf16.gmra.mrb[28].mxu1 %v2452_v3 }
  0x60   : > { %1225 = vmatprep.mubr.bf16.mxu0 %v2453_v4  ;;  %1354 = vmatprep.mubr.bf16.mxu1 %v2455_v5 }
  0x67   : > { %1226 = vmatmul.mubr.bf16.gmra.mrb[32].mxu0 %v2457_v6  ;;  %1355 = vmatmul.mubr.bf16.gmra.mrb[32].mxu1 %v2458_v7 }
  0x68   : > { %1233 = vmatprep.mubr.bf16.mxu0 %v2459_v8  ;;  %1362 = vmatprep.mubr.bf16.mxu1 %v2461_v9 }
  0x6f   : > { %1234 = vmatmul.mubr.bf16.gmra.mrb[36].mxu0 %v2463_v10  ;;  %1363 = vmatmul.mubr.bf16.gmra.mrb[36].mxu1 %v2464_v11 }
  0x70   : > { %1241 = vmatprep.mubr.bf16.mxu0 %v2466_v12  ;;  %1370 = vmatprep.mubr.bf16.mxu1 %v2468_v13 }
  0x77   : > { %1242 = vmatmul.mubr.bf16.gmra.mrb[40].mxu0 %v2470_v14  ;;  %1371 = vmatmul.mubr.bf16.gmra.mrb[40].mxu1 %v2471_v15 }
  0x78   : > { %1249 = vmatprep.mubr.bf16.mxu0 %v2472_v16  ;;  %1378 = vmatprep.mubr.bf16.mxu1 %v2474_v17 }
  0x7f   : > { %1250 = vmatmul.mubr.bf16.gmra.mrb[44].mxu0 %v2476_v18  ;;  %1379 = vmatmul.mubr.bf16.gmra.mrb[44].mxu1 %v2477_v19 }
  0x80   : > { %1386 = vmatprep.mubr.bf16.mxu1 %v2478_v20  ;;  %2297 = vmatprep.mubr.msk.bf16.mxu0 %vm1080_vm0, %v2480_v21 }
  0x87   : > { %1387 = vmatmul.mubr.bf16.gmra.mrb[48].mxu1 %v2481_v22  ;;  %2298 = vmatmul.mubr.msk.bf16.vlgmr.msra.gmra.mrb[48].mxu0 %vm1080_vm0, %v2482_v23 }
  0x88   : > { %1394 = vmatprep.mubr.bf16.mxu1 %v2483_v24  ;;  %2301 = vmatprep.mubr.msk.bf16.mxu0 %vm1080_vm0, %v2485_v25 }
  0x8f   : > { %1395 = vmatmul.mubr.bf16.gmra.mrb[52].mxu1 %v2486_v26  ;;  %2302 = vmatmul.mubr.msk.bf16.gmra.mrb[52].mxu0 %vm1080_vm0, %v2487_v27 }
  0x90   : > { %1402 = vmatprep.mubr.bf16.mxu1 %v2488_v28  ;;  %2305 = vmatprep.mubr.msk.bf16.mxu0 %vm1080_vm0, %v2490_v29 }
  0x97   : > { %1403 = vmatmul.mubr.bf16.gmra.mrb[56].mxu1 %v2491_v30  ;;  %2306 = vmatmul.mubr.msk.bf16.gmra.mrb[56].mxu0 %vm1080_vm0, %v2492_v31 }
  0x98   : > { %1410 = vmatprep.mubr.bf16.mxu1 %v2493_v32  ;;  %2309 = vmatprep.mubr.msk.bf16.mxu0 %vm1080_vm0, %v2495_v33 }
  0x9f   : > { %1411 = vmatmul.mubr.bf16.gmra.mrb[60].mxu1 %v2496_v34  ;;  %2310 = vmatmul.mubr.msk.bf16.gmra.mrb[60].mxu0 %vm1080_vm0, %v2497_v35 }
  0xa0   : > { %1418 = vmatprep.mubr.bf16.mxu1 %v2498_v36  ;;  %2313 = vmatprep.mubr.msk.bf16.mxu0 %vm1080_vm0, %v2500_v37 }
  0xa7   : > { %1419 = vmatmul.mubr.bf16.gmra.mrb[64].mxu1 %v2501_v38  ;;  %2314 = vmatmul.mubr.msk.bf16.gmra.mrb[64].mxu0 %vm1080_vm0, %v2502_v39 }
  0xa8   : > { %1426 = vmatprep.mubr.bf16.mxu1 %v2503_v40  ;;  %2317 = vmatprep.mubr.msk.bf16.mxu0 %vm1080_vm0, %v2505_v41 }
  0xaf   : > { %1427 = vmatmul.mubr.bf16.gmra.mrb[68].mxu1 %v2506_v42  ;;  %2318 = vmatmul.mubr.msk.bf16.gmra.mrb[68].mxu0 %vm1080_vm0, %v2507_v43 }
  0xb0   : > { %1434 = vmatprep.mubr.bf16.mxu1 %v2508_v44  ;;  %2321 = vmatprep.mubr.msk.bf16.mxu0 %vm1080_vm0, %v2510_v45 }
  0xb7   : > { %1435 = vmatmul.mubr.bf16.gmra.mrb[72].mxu1 %v2511_v46  ;;  %2322 = vmatmul.mubr.msk.bf16.gmra.mrb[72].mxu0 %vm1080_vm0, %v2512_v47 }
  0xb8   : > { %1442 = vmatprep.mubr.bf16.mxu1 %v2513_v48  ;;  %2325 = vmatprep.mubr.msk.bf16.mxu0 %vm1080_vm0, %v2515_v49 }
  0xbf   : > { %1443 = vmatmul.mubr.bf16.gmra.mrb[76].mxu1 %v2516_v50  ;;  %2326 = vmatmul.mubr.msk.bf16.gmra.mrb[76].mxu0 %vm1080_vm0, %v2517_v51 }
  0xfa   : > { %v2133_v52 = vpop.f32.mrb[0].mxu1  ;;  %v2061_v53 = vpop.f32.mrb[0].mxu0 }
  0xfb   : > { %v2134_v54 = vpop.f32.mrb[1].mxu1  ;;  %v2062_v55 = vpop.f32.mrb[1].mxu0 }
  0xfc   : > { %v2792_v56 = vadd.f32 %v2134_v54, %v2133_v52  ;;  %v2136_v57 = vpop.f32.mrb[2].mxu1  ;;  %v2063_v58 = vadd.f32 %v2062_v55, %v2061_v53  ;;  %v2064_v59 = vpop.f32.mrb[2].mxu0 }
  0xfd   : > { %v2137_v60 = vpop.f32.mrb[3].mxu1  ;;  %v2065_v61 = vpop.f32.mrb[3].mxu0 }
  0xfe   : > { %v2794_v62 = vadd.f32 %v2137_v60, %v2136_v57  ;;  %v2066_v63 = vadd.f32 %v2065_v61, %v2064_v59 }
 0x102   : > { %v2139_v0 = vpop.f32.mrb[4].mxu1  ;;  %v2067_v1 = vpop.f32.mrb[4].mxu0 }
 0x103   : > { %v2140_v2 = vpop.f32.mrb[5].mxu1  ;;  %v2068_v3 = vpop.f32.mrb[5].mxu0 }
 0x104   : > { %v2796_v4 = vadd.f32 %v2140_v2, %v2139_v0  ;;  %v2142_v5 = vpop.f32.mrb[6].mxu1  ;;  %v2069_v6 = vadd.f32 %v2068_v3, %v2067_v1  ;;  %v2070_v7 = vpop.f32.mrb[6].mxu0 }
 0x105   : > { %v2143_v8 = vpop.f32.mrb[7].mxu1  ;;  %v2071_v9 = vpop.f32.mrb[7].mxu0 }
 0x106   : > { %v2798_v10 = vadd.f32 %v2143_v8, %v2142_v5  ;;  %v2072_v11 = vadd.f32 %v2071_v9, %v2070_v7 }
 0x10a   : > { %v2145_v12 = vpop.f32.mrb[8].mxu1  ;;  %v2073_v13 = vpop.f32.mrb[8].mxu0 }
 0x10b   : > { %v2146_v14 = vpop.f32.mrb[9].mxu1  ;;  %v2074_v15 = vpop.f32.mrb[9].mxu0 }
 0x10c   : > { %v2800_v16 = vadd.f32 %v2146_v14, %v2145_v12  ;;  %v2148_v17 = vpop.f32.mrb[10].mxu1  ;;  %v2075_v18 = vadd.f32 %v2074_v15, %v2073_v13  ;;  %v2076_v19 = vpop.f32.mrb[10].mxu0 }
 0x10d   : > { %v2149_v20 = vpop.f32.mrb[11].mxu1  ;;  %v2077_v21 = vpop.f32.mrb[11].mxu0 }
 0x10e   : > { %v2802_v22 = vadd.f32 %v2149_v20, %v2148_v17  ;;  %v2078_v23 = vadd.f32 %v2077_v21, %v2076_v19 }
 0x112   : > { %v2151_v24 = vpop.f32.mrb[12].mxu1  ;;  %v2079_v25 = vpop.f32.mrb[12].mxu0 }
 0x113   : > { %v2152_v26 = vpop.f32.mrb[13].mxu1  ;;  %v2080_v27 = vpop.f32.mrb[13].mxu0 }
 0x114   : > { %v2804_v28 = vadd.f32 %v2152_v26, %v2151_v24  ;;  %v2154_v29 = vpop.f32.mrb[14].mxu1  ;;  %v2081_v30 = vadd.f32 %v2080_v27, %v2079_v25  ;;  %v2082_v31 = vpop.f32.mrb[14].mxu0 }
 0x115   : > { %v2155_v32 = vpop.f32.mrb[15].mxu1  ;;  %v2083_v33 = vpop.f32.mrb[15].mxu0 }
 0x116   : > { %v2806_v34 = vadd.f32 %v2155_v32, %v2154_v29  ;;  %v2084_v35 = vadd.f32 %v2083_v33, %v2082_v31 }
 0x11a   : > { %v2173_v36 = vpop.f32.mrb[16].mxu1  ;;  %v2085_v37 = vpop.f32.mrb[16].mxu0 }
 0x11b   : > { %v2174_v38 = vpop.f32.mrb[17].mxu1  ;;  %v2086_v39 = vpop.f32.mrb[17].mxu0 }
 0x11c   : > { %v2175_v40 = vadd.f32 %v2174_v38, %v2173_v36  ;;  %v2176_v41 = vpop.f32.mrb[18].mxu1  ;;  %v2087_v42 = vadd.f32 %v2086_v39, %v2085_v37  ;;  %v2088_v43 = vpop.f32.mrb[18].mxu0 }
 0x11d   : > { %v2177_v44 = vpop.f32.mrb[19].mxu1  ;;  %v2089_v45 = vpop.f32.mrb[19].mxu0 }
 0x11e   : > { %v2178_v46 = vadd.f32 %v2177_v44, %v2176_v41  ;;  %v2090_v47 = vadd.f32 %v2089_v45, %v2088_v43  ;;  %v2808_v48 = vadd.f32 %v2175_v40, %v2063_v58 }
 0x120   : > { %v2810_v49 = vadd.f32 %v2178_v46, %v2066_v63 }
 0x122   : > { %v2179_v50 = vpop.f32.mrb[20].mxu1  ;;  %v2091_v51 = vpop.f32.mrb[20].mxu0 }
 0x123   : > { %v2180_v52 = vpop.f32.mrb[21].mxu1  ;;  %v2092_v53 = vpop.f32.mrb[21].mxu0 }
 0x124   : > { %v2181_v54 = vadd.f32 %v2180_v52, %v2179_v50  ;;  %v2182_v55 = vpop.f32.mrb[22].mxu1  ;;  %v2093_v57 = vadd.f32 %v2092_v53, %v2091_v51  ;;  %v2094_v59 = vpop.f32.mrb[22].mxu0 }
 0x125   : > { %v2183_v60 = vpop.f32.mrb[23].mxu1  ;;  %v2095_v61 = vpop.f32.mrb[23].mxu0 }
 0x126   : > { %v2184_v0 = vadd.f32 %v2183_v60, %v2182_v55  ;;  %v2096_v1 = vadd.f32 %v2095_v61, %v2094_v59  ;;  %v2812_v2 = vadd.f32 %v2181_v54, %v2069_v6 }
 0x128   : > { %v2814_v3 = vadd.f32 %v2184_v0, %v2072_v11 }
 0x12a   : > { %v2185_v58 = vpop.f32.mrb[24].mxu1  ;;  %v2097_v5 = vpop.f32.mrb[24].mxu0 }
 0x12b   : > { %v2186_v63 = vpop.f32.mrb[25].mxu1  ;;  %v2098_v7 = vpop.f32.mrb[25].mxu0 }
 0x12c   : > { %v2187_v8 = vadd.f32 %v2186_v63, %v2185_v58  ;;  %v2188_v9 = vpop.f32.mrb[26].mxu1  ;;  %v2099_v12 = vadd.f32 %v2098_v7, %v2097_v5  ;;  %v2100_v13 = vpop.f32.mrb[26].mxu0 }
 0x12d   : > { %v2189_v14 = vpop.f32.mrb[27].mxu1  ;;  %v2101_v15 = vpop.f32.mrb[27].mxu0 }
 0x12e   : > { %v2190_v17 = vadd.f32 %v2189_v14, %v2188_v9  ;;  %v2102_v19 = vadd.f32 %v2101_v15, %v2100_v13  ;;  %v2816_v20 = vadd.f32 %v2187_v8, %v2075_v18 }
 0x130   : > { %v2818_v21 = vadd.f32 %v2190_v17, %v2078_v23 }
 0x132   : > { %v2191_v6 = vpop.f32.mrb[28].mxu1  ;;  %v2103_v24 = vpop.f32.mrb[28].mxu0 }
 0x133   : > { %v2192_v11 = vpop.f32.mrb[29].mxu1  ;;  %v2104_v25 = vpop.f32.mrb[29].mxu0 }
 0x134   : > { %v2193_v26 = vadd.f32 %v2192_v11, %v2191_v6  ;;  %v2194_v27 = vpop.f32.mrb[30].mxu1  ;;  %v2105_v29 = vadd.f32 %v2104_v25, %v2103_v24  ;;  %v2106_v31 = vpop.f32.mrb[30].mxu0 }
 0x135   : > { %v2195_v32 = vpop.f32.mrb[31].mxu1  ;;  %v2107_v33 = vpop.f32.mrb[31].mxu0 }
 0x136   : > { %v2196_v36 = vadd.f32 %v2195_v32, %v2194_v27  ;;  %v2108_v37 = vadd.f32 %v2107_v33, %v2106_v31  ;;  %v2820_v38 = vadd.f32 %v2193_v26, %v2081_v30 }
 0x138   : > { %v2822_v39 = vadd.f32 %v2196_v36, %v2084_v35 }
 0x13a   : > { %v2197_v18 = vpop.f32.mrb[32].mxu1  ;;  %v2109_v40 = vpop.f32.mrb[32].mxu0 }
 0x13b   : > { %v2198_v23 = vpop.f32.mrb[33].mxu1  ;;  %v2110_v41 = vpop.f32.mrb[33].mxu0 }
 0x13c   : > { %v2199_v43 = vadd.f32 %v2198_v23, %v2197_v18  ;;  %v2200_v44 = vpop.f32.mrb[34].mxu1  ;;  %v2824_v45 = vadd.f32 %v2110_v41, %v2109_v40  ;;  %v2112_v46 = vpop.f32.mrb[34].mxu0 }
 0x13d   : > { %v2201_v50 = vpop.f32.mrb[35].mxu1  ;;  %v2113_v51 = vpop.f32.mrb[35].mxu0 }
 0x13e   : > { %v2202_v52 = vadd.f32 %v2201_v50, %v2200_v44  ;;  %v2826_v53 = vadd.f32 %v2113_v51, %v2112_v46  ;;  %v2828_v54 = vadd.f32 %v2199_v43, %v2087_v42 }
 0x140   : > { %v2830_v30 = vadd.f32 %v2202_v52, %v2090_v47 }
 0x142   : > { %v2203_v35 = vpop.f32.mrb[36].mxu1  ;;  %v2115_v55 = vpop.f32.mrb[36].mxu0 }
 0x143   : > { %v2204_v59 = vpop.f32.mrb[37].mxu1  ;;  %v2116_v60 = vpop.f32.mrb[37].mxu0 }
 0x144   : > { %v2205_v61 = vadd.f32 %v2204_v59, %v2203_v35  ;;  %v2206_v0 = vpop.f32.mrb[38].mxu1  ;;  %v2832_v58 = vadd.f32 %v2116_v60, %v2115_v55  ;;  %v2118_v5 = vpop.f32.mrb[38].mxu0  ;;  %v2859_v59 = vld [vmem:[%s2992_s2] ss:$0 sm:$0xff] }
 0x145   : > { %v2207_v63 = vpop.f32.mrb[39].mxu1  ;;  %v2119_v7 = vpop.f32.mrb[39].mxu0 }
 0x146   : > { %v2208_v8 = vadd.f32 %v2207_v63, %v2206_v0  ;;  %v2834_v9 = vadd.f32 %v2119_v7, %v2118_v5  ;;  %v2836_v13 = vadd.f32 %v2205_v61, %v2093_v57 }
 0x148   : > { %v2838_v42 = vadd.f32 %v2208_v8, %v2096_v1 }
 0x14a   : > { %v2209_v47 = vpop.f32.mrb[40].mxu1  ;;  %v2121_v14 = vpop.f32.mrb[40].mxu0 }
 0x14b   : > { %v2210_v15 = vpop.f32.mrb[41].mxu1  ;;  %v2122_v17 = vpop.f32.mrb[41].mxu0 }
 0x14c   : > { %v2211_v6 = vadd.f32 %v2210_v15, %v2209_v47  ;;  %v2212_v24 = vpop.f32.mrb[42].mxu1  ;;  %v2840_v11 = vadd.f32 %v2122_v17, %v2121_v14  ;;  %v2124_v25 = vpop.f32.mrb[42].mxu0 }
 0x14d   : > { %v2213_v26 = vpop.f32.mrb[43].mxu1  ;;  %v2125_v27 = vpop.f32.mrb[43].mxu0 }
 0x14e   : > { %v2214_v31 = vadd.f32 %v2213_v26, %v2212_v24  ;;  %v2842_v32 = vadd.f32 %v2125_v27, %v2124_v25  ;;  %v2844_v33 = vadd.f32 %v2211_v6, %v2099_v12 }
 0x150   : > { %v2846_v57 = vadd.f32 %v2214_v31, %v2102_v19 }
 0x152   : > { %v2215_v1 = vpop.f32.mrb[44].mxu1  ;;  %v2127_v36 = vpop.f32.mrb[44].mxu0 }
 0x153   : > { %v2216_v18 = vpop.f32.mrb[45].mxu1  ;;  %v2128_v40 = vpop.f32.mrb[45].mxu0 }
 0x154   : > { %v2217_v23 = vadd.f32 %v2216_v18, %v2215_v1  ;;  %v2218_v41 = vpop.f32.mrb[46].mxu1  ;;  %v2848_v43 = vadd.f32 %v2128_v40, %v2127_v36  ;;  %v2130_v44 = vpop.f32.mrb[46].mxu0 }
 0x155   : > { %v2219_v46 = vpop.f32.mrb[47].mxu1  ;;  %v2131_v50 = vpop.f32.mrb[47].mxu0 }
 0x156   : > { %v2220_v51 = vadd.f32 %v2219_v46, %v2218_v41  ;;  %v2850_v52 = vadd.f32 %v2131_v50, %v2130_v44  ;;  %v2852_v35 = vadd.f32 %v2217_v23, %v2105_v29 }
 0x158   : > { %v2854_v12 = vadd.f32 %v2220_v51, %v2108_v37 }
 0x15a   : > { %v2221_v19 = vpop.f32.mrb[48].mxu1  ;;  %v2299_v55 = vpop.f32.mrb[48].mxu0 }
 0x15b   : > { %v1494_v60 = vadd.f32 %v2299_v55, %v2812_v2  ;;  %v2222_v61 = vpop.f32.mrb[49].mxu1  ;;  %v1485_v0 = vpop.f32.mrb[49].mxu0 }
 0x15c   : > { %v2223_v5 = vadd.f32 %v2222_v61, %v2221_v19  ;;  %v1486_v63 = vadd.f32 %v1485_v0, %v2808_v48  ;;  %v2224_v7 = vpop.f32.mrb[50].mxu1  ;;  %v2300_v29 = vpop.f32.mrb[50].mxu0 }
 0x15d   : > { %v1720_v37 = vadd.f32 %v2859_v59, %v1494_v60  ;;  %v1497_v8 = vadd.f32 %v2300_v29, %v2814_v3  ;;  %v2225_v47 = vpop.f32.mrb[51].mxu1  ;;  %v1488_v14 = vpop.f32.mrb[51].mxu0 }
 0x15e   : > { %v1718_v2 = vadd.f32 %v2859_v59, %v1486_v63  ;;  %v2226_v15 = vadd.f32 %v2225_v47, %v2224_v7  ;;  %v1489_v48 = vadd.f32 %v1488_v14, %v2810_v49  ;;  %v2874_v17 = vadd.f32 %v2223_v5, %v2824_v45 }
 0x15f   : > { %v1752_v3 = vmax.f32 %v1720_v37, 0.0  ;;  %v1721_v6 = vadd.f32 %v2859_v59, %v1497_v8 }
 0x160   : > { %v1750_v24 = vmax.f32 %v1718_v2, 0.0  ;;  %v1719_v25 = vadd.f32 %v2859_v59, %v1489_v48  ;;  %v2879_v26 = vadd.f32 %v2226_v15, %v2826_v53 }
 0x161   : > { %1784 = vst [vmem:[%s2869_s30 + $0x10] sm:$0xff] %v1752_v3  ;;  %v1753_v27 = vmax.f32 %v1721_v6, 0.0 }
 0x162   : > { %1782 = vst [vmem:[%s2869_s30] sm:$0xff] %v1750_v24  ;;  %v1751_v31 = vmax.f32 %v1719_v25, 0.0  ;;  %v2227_v1 = vpop.f32.mrb[52].mxu1  ;;  %v2303_v36 = vpop.f32.mrb[52].mxu0 }
 0x163   : > { %1785 = vst [vmem:[%s2869_s30 + $0x18] sm:$0xff] %v1753_v27  ;;  %v1510_v49 = vadd.f32 %v2303_v36, %v2820_v38  ;;  %v2228_v45 = vpop.f32.mrb[53].mxu1  ;;  %v1501_v18 = vpop.f32.mrb[53].mxu0 }
 0x164   : > { %1783 = vst [vmem:[%s2869_s30 + $0x8] sm:$0xff] %v1751_v31  ;;  %v2229_v40 = vadd.f32 %v2228_v45, %v2227_v1  ;;  %v1502_v23 = vadd.f32 %v1501_v18, %v2816_v20  ;;  %v2230_v41 = vpop.f32.mrb[54].mxu1  ;;  %v2304_v44 = vpop.f32.mrb[54].mxu0 }
 0x165   : > { %v1724_v53 = vadd.f32 %v2859_v59, %v1510_v49  ;;  %v1513_v46 = vadd.f32 %v2304_v44, %v2822_v39  ;;  %v2231_v50 = vpop.f32.mrb[55].mxu1  ;;  %v1504_v51 = vpop.f32.mrb[55].mxu0 }
 0x166   : > { %v1722_v19 = vadd.f32 %v2859_v59, %v1502_v23  ;;  %v2232_v38 = vadd.f32 %v2231_v50, %v2230_v41  ;;  %v1505_v55 = vadd.f32 %v1504_v51, %v2818_v21  ;;  %v2892_v60 = vadd.f32 %v2229_v40, %v2832_v58 }
 0x167   : > { %v1756_v20 = vmax.f32 %v1724_v53, 0.0  ;;  %v1725_v61 = vadd.f32 %v2859_v59, %v1513_v46 }
 0x168   : > { %v1754_v0 = vmax.f32 %v1722_v19, 0.0  ;;  %v1723_v5 = vadd.f32 %v2859_v59, %v1505_v55  ;;  %v2897_v39 = vadd.f32 %v2232_v38, %v2834_v9 }
 0x169   : > { %1788 = vst [vmem:[%s2869_s30 + $0x30] sm:$0xff] %v1756_v20  ;;  %v1757_v63 = vmax.f32 %v1725_v61, 0.0 }
 0x16a   : > { %1786 = vst [vmem:[%s2869_s30 + $0x20] sm:$0xff] %v1754_v0  ;;  %v1755_v7 = vmax.f32 %v1723_v5, 0.0  ;;  %v2233_v29 = vpop.f32.mrb[56].mxu1  ;;  %v2307_v37 = vpop.f32.mrb[56].mxu0 }
 0x16b   : > { %1789 = vst [vmem:[%s2869_s30 + $0x38] sm:$0xff] %v1757_v63  ;;  %v1526_v21 = vadd.f32 %v2307_v37, %v2836_v13  ;;  %v2234_v58 = vpop.f32.mrb[57].mxu1  ;;  %v1517_v8 = vpop.f32.mrb[57].mxu0 }
 0x16c   : > { %1787 = vst [vmem:[%s2869_s30 + $0x28] sm:$0xff] %v1755_v7  ;;  %v2235_v47 = vadd.f32 %v2234_v58, %v2233_v29  ;;  %v1518_v14 = vadd.f32 %v1517_v8, %v2828_v54  ;;  %v2236_v2 = vpop.f32.mrb[58].mxu1  ;;  %v2308_v15 = vpop.f32.mrb[58].mxu0 }
 0x16d   : > { %v1728_v9 = vadd.f32 %v2859_v59, %v1526_v21  ;;  %v1529_v48 = vadd.f32 %v2308_v15, %v2838_v42  ;;  %v2237_v3 = vpop.f32.mrb[59].mxu1  ;;  %v1520_v6 = vpop.f32.mrb[59].mxu0 }
 0x16e   : > { %v1726_v24 = vadd.f32 %v2859_v59, %v1518_v14  ;;  %v2238_v13 = vadd.f32 %v2237_v3, %v2236_v2  ;;  %v1521_v25 = vadd.f32 %v1520_v6, %v2830_v30  ;;  %v2910_v27 = vadd.f32 %v2235_v47, %v2840_v11 }
 0x16f   : > { %v1760_v54 = vmax.f32 %v1728_v9, 0.0  ;;  %v1729_v31 = vadd.f32 %v2859_v59, %v1529_v48 }
 0x170   : > { %v1758_v1 = vmax.f32 %v1726_v24, 0.0  ;;  %v1727_v36 = vadd.f32 %v2859_v59, %v1521_v25  ;;  %v2915_v42 = vadd.f32 %v2238_v13, %v2842_v32 }
 0x171   : > { %1792 = vst [vmem:[%s2869_s30 + $0x50] sm:$0xff] %v1760_v54  ;;  %v1761_v49 = vmax.f32 %v1729_v31, 0.0 }
 0x172   : > { %1790 = vst [vmem:[%s2869_s30 + $0x40] sm:$0xff] %v1758_v1  ;;  %v1759_v45 = vmax.f32 %v1727_v36, 0.0  ;;  %v2239_v18 = vpop.f32.mrb[60].mxu1  ;;  %v2311_v40 = vpop.f32.mrb[60].mxu0 }
 0x173   : > { %1793 = vst [vmem:[%s2869_s30 + $0x58] sm:$0xff] %v1761_v49  ;;  %v1542_v30 = vadd.f32 %v2311_v40, %v2852_v35  ;;  %v2240_v11 = vpop.f32.mrb[61].mxu1  ;;  %v1533_v23 = vpop.f32.mrb[61].mxu0 }
 0x174   : > { %1791 = vst [vmem:[%s2869_s30 + $0x48] sm:$0xff] %v1759_v45  ;;  %v2241_v41 = vadd.f32 %v2240_v11, %v2239_v18  ;;  %v1534_v44 = vadd.f32 %v1533_v23, %v2844_v33  ;;  %v2242_v53 = vpop.f32.mrb[62].mxu1  ;;  %v2312_v46 = vpop.f32.mrb[62].mxu0 }
 0x175   : > { %v1732_v32 = vadd.f32 %v2859_v59, %v1542_v30  ;;  %v1545_v50 = vadd.f32 %v2312_v46, %v2854_v12  ;;  %v2243_v51 = vpop.f32.mrb[63].mxu1  ;;  %v1536_v19 = vpop.f32.mrb[63].mxu0 }
 0x176   : > { %v1730_v38 = vadd.f32 %v2859_v59, %v1534_v44  ;;  %v2244_v35 = vadd.f32 %v2243_v51, %v2242_v53  ;;  %v1537_v55 = vadd.f32 %v1536_v19, %v2846_v57  ;;  %v1413_v20 = vadd.f32 %v2241_v41, %v2848_v43 }
 0x177   : > { %v1764_v33 = vmax.f32 %v1732_v32, 0.0  ;;  %v1733_v61 = vadd.f32 %v2859_v59, %v1545_v50 }
 0x178   : > { %v1762_v0 = vmax.f32 %v1730_v38, 0.0  ;;  %v1731_v5 = vadd.f32 %v2859_v59, %v1537_v55  ;;  %v1416_v63 = vadd.f32 %v2244_v35, %v2850_v52 }
 0x179   : > { %1796 = vst [vmem:[%s2869_s30 + $0x70] sm:$0xff] %v1764_v33  ;;  %v1765_v12 = vmax.f32 %v1733_v61, 0.0 }
 0x17a   : > { %1794 = vst [vmem:[%s2869_s30 + $0x60] sm:$0xff] %v1762_v0  ;;  %v1763_v7 = vmax.f32 %v1731_v5, 0.0  ;;  %v2245_v29 = vpop.f32.mrb[64].mxu1  ;;  %v2315_v37 = vpop.f32.mrb[64].mxu0 }
 0x17b   : > { %1797 = vst [vmem:[%s2869_s30 + $0x78] sm:$0xff] %v1765_v12  ;;  %v1558_v57 = vadd.f32 %v2315_v37, %v2892_v60  ;;  %v2246_v21 = vpop.f32.mrb[65].mxu1  ;;  %v1549_v43 = vpop.f32.mrb[65].mxu0 }
 0x17c   : > { %1795 = vst [vmem:[%s2869_s30 + $0x68] sm:$0xff] %v1763_v7  ;;  %v2247_v58 = vadd.f32 %v2246_v21, %v2245_v29  ;;  %v1550_v8 = vadd.f32 %v1549_v43, %v2874_v17  ;;  %v2248_v47 = vpop.f32.mrb[66].mxu1  ;;  %v2316_v14 = vpop.f32.mrb[66].mxu0 }
 0x17d   : > { %v1736_v52 = vadd.f32 %v2859_v59, %v1558_v57  ;;  %v1561_v2 = vadd.f32 %v2316_v14, %v2897_v39  ;;  %v2249_v15 = vpop.f32.mrb[67].mxu1  ;;  %v1552_v9 = vpop.f32.mrb[67].mxu0 }
 0x17e   : > { %v1734_v48 = vadd.f32 %v2859_v59, %v1550_v8  ;;  %v2250_v60 = vadd.f32 %v2249_v15, %v2248_v47  ;;  %v1553_v3 = vadd.f32 %v1552_v9, %v2879_v26  ;;  %v1421_v6 = vadd.f32 %v2247_v58, %v2792_v56 }
 0x17f   : > { %v1768_v17 = vmax.f32 %v1736_v52, 0.0  ;;  %v1737_v24 = vadd.f32 %v2859_v59, %v1561_v2 }
 0x180   : > { %v1766_v13 = vmax.f32 %v1734_v48, 0.0  ;;  %v1735_v25 = vadd.f32 %v2859_v59, %v1553_v3  ;;  %v1424_v54 = vadd.f32 %v2250_v60, %v2794_v62 }
 0x181   : > { %1800 = vst [vmem:[%s2869_s30 + $0x90] sm:$0xff] %v1768_v17  ;;  %v1769_v39 = vmax.f32 %v1737_v24, 0.0 }
 0x182   : > { %1798 = vst [vmem:[%s2869_s30 + $0x80] sm:$0xff] %v1766_v13  ;;  %v1767_v31 = vmax.f32 %v1735_v25, 0.0  ;;  %v2251_v1 = vpop.f32.mrb[68].mxu1  ;;  %v2319_v36 = vpop.f32.mrb[68].mxu0 }
 0x183   : > { %1801 = vst [vmem:[%s2869_s30 + $0x98] sm:$0xff] %v1769_v39  ;;  %v1574_v49 = vadd.f32 %v2319_v36, %v1413_v20  ;;  %v2252_v26 = vpop.f32.mrb[69].mxu1  ;;  %v1565_v45 = vpop.f32.mrb[69].mxu0 }
 0x184   : > { %1799 = vst [vmem:[%s2869_s30 + $0x88] sm:$0xff] %v1767_v31  ;;  %v2253_v56 = vadd.f32 %v2252_v26, %v2251_v1  ;;  %v1566_v18 = vadd.f32 %v1565_v45, %v2910_v27  ;;  %v2254_v40 = vpop.f32.mrb[70].mxu1  ;;  %v2320_v30 = vpop.f32.mrb[70].mxu0 }
 0x185   : > { %v1740_v62 = vadd.f32 %v2859_v59, %v1574_v49  ;;  %v1577_v11 = vadd.f32 %v2320_v30, %v1416_v63  ;;  %v2255_v23 = vpop.f32.mrb[71].mxu1  ;;  %v1568_v41 = vpop.f32.mrb[71].mxu0 }
 0x186   : > { %v1738_v44 = vadd.f32 %v2859_v59, %v1566_v18  ;;  %v2256_v53 = vadd.f32 %v2255_v23, %v2254_v40  ;;  %v1569_v46 = vadd.f32 %v1568_v41, %v2915_v42  ;;  %v1429_v32 = vadd.f32 %v2253_v56, %v2796_v4 }
 0x187   : > { %v1772_v50 = vmax.f32 %v1740_v62, 0.0  ;;  %v1741_v27 = vadd.f32 %v2859_v59, %v1577_v11 }
 0x188   : > { %v1770_v51 = vmax.f32 %v1738_v44, 0.0  ;;  %v1739_v19 = vadd.f32 %v2859_v59, %v1569_v46  ;;  %v1432_v38 = vadd.f32 %v2256_v53, %v2798_v10 }
 0x189   : > { %1804 = vst [vmem:[%s2869_s30 + $0xb0] sm:$0xff] %v1772_v50  ;;  %v1773_v35 = vmax.f32 %v1741_v27, 0.0 }
 0x18a   : > { %1802 = vst [vmem:[%s2869_s30 + $0xa0] sm:$0xff] %v1770_v51  ;;  %v1771_v55 = vmax.f32 %v1739_v19, 0.0  ;;  %v2257_v20 = vpop.f32.mrb[72].mxu1  ;;  %v2323_v33 = vpop.f32.mrb[72].mxu0 }
 0x18b   : > { %1805 = vst [vmem:[%s2869_s30 + $0xb8] sm:$0xff] %v1773_v35  ;;  %v1590_v61 = vadd.f32 %v2323_v33, %v1429_v32  ;;  %v2258_v42 = vpop.f32.mrb[73].mxu1  ;;  %v1581_v0 = vpop.f32.mrb[73].mxu0 }
 0x18c   : > { %1803 = vst [vmem:[%s2869_s30 + $0xa8] sm:$0xff] %v1771_v55  ;;  %v2259_v4 = vadd.f32 %v2258_v42, %v2257_v20  ;;  %v1582_v5 = vadd.f32 %v1581_v0, %v1421_v6  ;;  %v2260_v63 = vpop.f32.mrb[74].mxu1  ;;  %v2324_v12 = vpop.f32.mrb[74].mxu0 }
 0x18d   : > { %v1744_v7 = vadd.f32 %v2859_v59, %v1590_v61  ;;  %v1593_v10 = vadd.f32 %v2324_v12, %v1432_v38  ;;  %v2261_v29 = vpop.f32.mrb[75].mxu1  ;;  %v1584_v37 = vpop.f32.mrb[75].mxu0 }
 0x18e   : > { %v1742_v57 = vadd.f32 %v2859_v59, %v1582_v5  ;;  %v2262_v21 = vadd.f32 %v2261_v29, %v2260_v63  ;;  %v1585_v43 = vadd.f32 %v1584_v37, %v1424_v54  ;;  %v1437_v58 = vadd.f32 %v2259_v4, %v2800_v16 }
 0x18f   : > { %v1776_v8 = vmax.f32 %v1744_v7, 0.0  ;;  %v1745_v47 = vadd.f32 %v2859_v59, %v1593_v10 }
 0x190   : > { %v1774_v14 = vmax.f32 %v1742_v57, 0.0  ;;  %v1743_v52 = vadd.f32 %v2859_v59, %v1585_v43  ;;  %v1440_v2 = vadd.f32 %v2262_v21, %v2802_v22 }
 0x191   : > { %1808 = vst [vmem:[%s2869_s30 + $0xd0] sm:$0xff] %v1776_v8  ;;  %v1777_v15 = vmax.f32 %v1745_v47, 0.0 }
 0x192   : > { %1806 = vst [vmem:[%s2869_s30 + $0xc0] sm:$0xff] %v1774_v14  ;;  %v1775_v9 = vmax.f32 %v1743_v52, 0.0  ;;  %v2263_v48 = vpop.f32.mrb[76].mxu1  ;;  %v2327_v60 = vpop.f32.mrb[76].mxu0 }
 0x193   : > { %1809 = vst [vmem:[%s2869_s30 + $0xd8] sm:$0xff] %v1777_v15  ;;  %v2264_v3 = vpop.f32.mrb[77].mxu1  ;;  %v1597_v6 = vpop.f32.mrb[77].mxu0 }
 0x194   : > { %1807 = vst [vmem:[%s2869_s30 + $0xc8] sm:$0xff] %v1775_v9  ;;  %v2265_v16 = vadd.f32 %v2264_v3, %v2263_v48  ;;  %v1598_v17 = vadd.f32 %v1597_v6, %v1437_v58  ;;  %v2266_v24 = vpop.f32.mrb[78].mxu1  ;;  %v2328_v13 = vpop.f32.mrb[78].mxu0 }
 0x195   : > { %v2267_v25 = vpop.f32.mrb[79].mxu1  ;;  %v1600_v54 = vpop.f32.mrb[79].mxu0 }
 0x196   : > { %v1445_v22 = vadd.f32 %v2265_v16, %v2804_v28  ;;  %v1746_v39 = vadd.f32 %v2859_v59, %v1598_v17  ;;  %v2268_v31 = vadd.f32 %v2267_v25, %v2266_v24  ;;  %v1601_v1 = vadd.f32 %v1600_v54, %v1440_v2 }
 0x198   : > { %v1606_v36 = vadd.f32 %v2327_v60, %v1445_v22  ;;  %v1778_v49 = vmax.f32 %v1746_v39, 0.0  ;;  %v1448_v26 = vadd.f32 %v2268_v31, %v2806_v34  ;;  %v1747_v45 = vadd.f32 %v2859_v59, %v1601_v1 }
 0x19a   : > { %v1748_v56 = vadd.f32 %v2859_v59, %v1606_v36  ;;  %1810 = vst [vmem:[%s2869_s30 + $0xe0] sm:$0xff] %v1778_v49  ;;  %v1609_v18 = vadd.f32 %v2328_v13, %v1448_v26  ;;  %v1779_v40 = vmax.f32 %v1747_v45, 0.0 }
 0x19c   : > { %v1780_v30 = vmax.f32 %v1748_v56, 0.0  ;;  %v1749_v62 = vadd.f32 %v2859_v59, %v1609_v18  ;;  %1811 = vst [vmem:[%s2869_s30 + $0xe8] sm:$0xff] %v1779_v40 }
 0x19e   : > { %1812 = vst [vmem:[%s2869_s30 + $0xf0] sm:$0xff] %v1780_v30  ;;  %v1781_v28 = vmax.f32 %v1749_v62, 0.0 }
 0x1a0   : > { %1813 = vst [vmem:[%s2869_s30 + $0xf8] sm:$0xff] %v1781_v28 }
 0x1a1 PF: > { %s13_s14 = sadd.s32 1, %s2540_s14   ;;  %s2994_s12 = smov %s2536_s13 }
 0x1a2   : > { %p10_p5 = scmp.ge.s32.totalorder %s13_s14, 4   ;;  %s2995_s13 = smov %s2997_s15 }
 0x1a4   :  { %12 = sbr.rel (!%p10_p5) target bundleno = 2 (0x2), region = 73 }

// kernel: inception_b_forward.8
= control target key start
LH: loop header
LB: loop body
LE: loop exit
PB: predicated region body
PF: predicated region fallthrough
CT: control target
= control target key end

     0   :  { %s1681_s12 = smov 0   ;;  %s1683_s13 = smov 0   ;;  %s1942_s0 = inlined_call_operand.vmem [shape: bf16[128,864], index: 0, kind: input, shape index: {}]   ;;  %s1943_s1 = inlined_call_operand.vmem [shape: bf16[864,128], index: 1, kind: input, shape index: {}]   ;;  %s1944_s2 = inlined_call_operand.vmem [shape: f32[1,128], index: 2, kind: input, shape index: {}]   ;;  %s1945_s3 = inlined_call_operand.vmem [shape: f32[128,128], index: 3, kind: output, shape index: {}]  }
   0x1   :  { %s1685_s14 = smov 0  }
   0x2 LB: > { %s25_s15 = sadd.s32 1, %s1655_s13  ;;  %p1274_p0 = scmp.ge.s32.totalorder %s1659_s14, 1  ;;  %s1659_s14 = sphi %s1685_s14, %s13_s14   ;;  %s1655_s13 = sphi %s1683_s13, %s1947_s13   ;;  %s1651_s12 = sphi %s1681_s12, %s1946_s12  }
   0x3   : > { %p27_p1 = scmp.ge.s32.totalorder %s25_s15, 2  ;;  %p169_p2 = scmp.lt.s32.totalorder %s1659_s14, 3 }
   0x5   : > { %s1949_s15 = smov (%p27_p1, %s25_s15), 0  ;;  %p170_p3 = pnand %p1274_p0, %p169_p2 }
   0x6   : > { %v1543_v0 = vld [vmem:[%s1943_s1 + $0x40] sm:$0xff] (!%p170_p3)   ;;  %v1547_v4 = vld [vmem:[%s1943_s1 + $0x48] sm:$0xff] (!%p170_p3)   ;;  %v1551_v8 = vld [vmem:[%s1943_s1 + $0x50] sm:$0xff] (!%p170_p3)   ;;  %s1275_s23 = sshll.u32 (!%p170_p3), %s1651_s12, 3  ;;  %vm852_vm0 = vcmask (!%p170_p3), 785408  }
   0x7   : > { %173 = sbr.rel (%p170_p3) target bundleno = 322 (0x142), region = 32  ;;  %v1544_v1 = vld [vmem:[%s1943_s1 + $0xc0] sm:$0xff] (!%p170_p3)   ;;  %1368 = vmatprep.subr.bf16.mxu0 (!%p170_p3), %v1543_v0  ;;  %v1548_v5 = vld [vmem:[%s1943_s1 + $0xc8] sm:$0xff] (!%p170_p3)   ;;  %v1552_v9 = vld [vmem:[%s1943_s1 + $0xd0] sm:$0xff] (!%p170_p3)   ;;  %p205_p4 = scmp.lt.s32.totalorder (!%p170_p3), %s1275_s23, 15 }
   0x8   : > { %v1545_v2 = vld [vmem:[%s1943_s1] sm:$0xff] (!%p170_p3)   ;;  %1408 = vmatprep.subr.bf16.mxu1 (!%p170_p3), %v1544_v1  ;;  %v1549_v6 = vld [vmem:[%s1943_s1 + $0x8] sm:$0xff] (!%p170_p3)   ;;  %v1553_v10 = vld [vmem:[%s1943_s1 + $0x10] sm:$0xff] (!%p170_p3)  }
   0x9   : > { %v1546_v3 = vld [vmem:[%s1943_s1 + $0x80] sm:$0xff] (!%p170_p3)   ;;  %1369 = vmatpush3.bf16.msra.mxu0 (!%p170_p3), %v1545_v2  ;;  %v1550_v7 = vld [vmem:[%s1943_s1 + $0x88] sm:$0xff] (!%p170_p3)   ;;  %v1554_v11 = vld [vmem:[%s1943_s1 + $0x90] sm:$0xff] (!%p170_p3)  }
   0xa   : > { %1409 = vmatpush3.bf16.msra.mxu1 (!%p170_p3), %v1546_v3  ;;  %1370 = vmatprep.subr.bf16.mxu0 (!%p170_p3), %v1547_v4  ;;  %v1555_v12 = vld [vmem:[%s1943_s1 + $0x58] sm:$0xff] (!%p170_p3)   ;;  %v1559_v16 = vld [vmem:[%s1943_s1 + $0x60] sm:$0xff] (!%p170_p3)   ;;  %v1563_v20 = vld [vmem:[%s1943_s1 + $0x68] sm:$0xff] (!%p170_p3)  }
   0xb   : > { %1410 = vmatprep.subr.bf16.mxu1 (!%p170_p3), %v1548_v5  ;;  %v1556_v13 = vld [vmem:[%s1943_s1 + $0xd8] sm:$0xff] (!%p170_p3)   ;;  %v1560_v17 = vld [vmem:[%s1943_s1 + $0xe0] sm:$0xff] (!%p170_p3)   ;;  %v1564_v21 = vld [vmem:[%s1943_s1 + $0xe8] sm:$0xff] (!%p170_p3)  }
   0xc   : > { %v1557_v14 = vld [vmem:[%s1943_s1 + $0x18] sm:$0xff] (!%p170_p3)   ;;  %v1561_v18 = vld [vmem:[%s1943_s1 + $0x20] sm:$0xff] (!%p170_p3)   ;;  %v1565_v22 = vld [vmem:[%s1943_s1 + $0x28] sm:$0xff] (!%p170_p3)  }
   0xd   : > { %1371 = vmatpush3.bf16.msra.mxu0 (!%p170_p3), %v1549_v6  ;;  %v1558_v15 = vld [vmem:[%s1943_s1 + $0x98] sm:$0xff] (!%p170_p3)   ;;  %v1562_v19 = vld [vmem:[%s1943_s1 + $0xa0] sm:$0xff] (!%p170_p3)   ;;  %v1566_v23 = vld [vmem:[%s1943_s1 + $0xa8] sm:$0xff] (!%p170_p3)  }
   0xe   : > { %1411 = vmatpush3.bf16.msra.mxu1 %v1550_v7  ;;  %1372 = vmatprep.subr.bf16.mxu0 %v1551_v8  ;;  %s1951_s23 = smov (!%p205_p4, %s1275_s23), 15  ;;  %v1567_v24 = vld [vmem:[%s1943_s1 + $0x70] sm:$0xff]   ;;  %v1571_v28 = vld [vmem:[%s1943_s1 + $0x78] sm:$0xff]   ;;  %v1581_v36 = vld [vmem:[%s1943_s1 + $0x140] sm:$0xff]  }
   0xf   : > { %1412 = vmatprep.subr.bf16.mxu1 %v1552_v9  ;;  %v1568_v25 = vld [vmem:[%s1943_s1 + $0xf0] sm:$0xff]   ;;  %s1518_s22 = smul.u32 28, %s1951_s23  ;;  %v1572_v29 = vld [vmem:[%s1943_s1 + $0xf8] sm:$0xff]   ;;  %v1582_v37 = vld [vmem:[%s1943_s1 + $0x100] sm:$0xff]   ;;  %s1278_s16 = sshll.u32 %s1951_s23, 3 }
  0x10   : > { %v1569_v26 = vld [vmem:[%s1943_s1 + $0x30] sm:$0xff]   ;;  %v1573_v30 = vld [vmem:[%s1943_s1 + $0x38] sm:$0xff]   ;;  %v1583_v38 = vld [vmem:[%s1943_s1 + $0x148] sm:$0xff]   ;;  %s1919_s19 = scalar_lea.vmem %s1945_s3, %s1278_s16 }
  0x11   : > { %1373 = vmatpush3.bf16.msra.mxu0 %v1553_v10  ;;  %v1570_v27 = vld [vmem:[%s1943_s1 + $0xb0] sm:$0xff]   ;;  %s1798_s6 = scalar_lea.vmem %s1942_s0, %s1518_s22  ;;  %v1574_v31 = vld [vmem:[%s1943_s1 + $0xb8] sm:$0xff]   ;;  %v1584_v39 = vld [vmem:[%s1943_s1 + $0x108] sm:$0xff]  }
  0x12   : > { %1413 = vmatpush3.bf16.msra.mxu1 %v1554_v11  ;;  %1374 = vmatprep.subr.bf16.mxu0 %v1555_v12  ;;  %v1575_v32 = vld [vmem:[%s1798_s6] ss:$28 sps:$4 sm:$0xff]   ;;  %v1578_v34 = vld [vmem:[%s1798_s6 + $0x8] ss:$28 sps:$4 sm:$0xff]   ;;  %v1589_v42 = vld [vmem:[%s1798_s6 + $0x38] ss:$28 sps:$4 sm:$0xff]  }
  0x13   : > { %1414 = vmatprep.subr.bf16.mxu1 %v1556_v13  ;;  %v1577_v33 = vld [vmem:[%s1798_s6 + $0x4] ss:$28 sps:$4 sm:$0xff]   ;;  %v1580_v35 = vld [vmem:[%s1798_s6 + $0xc] ss:$28 sps:$4 sm:$0xff]   ;;  %v1585_v40 = vld [vmem:[%s1798_s6 + $0x3c] ss:$28 sps:$4 sm:$0xff]  }
  0x14   : > { %897 = vmatprep.mubr.bf16.mxu0 %v1577_v33  ;;  %962 = vmatprep.mubr.bf16.mxu1 %v1580_v35  ;;  %v1587_v41 = vld [vmem:[%s1798_s6 + $0x44] ss:$28 sps:$4 sm:$0xff]   ;;  %v1591_v44 = vld [vmem:[%s1943_s1 + $0x150] sm:$0xff]   ;;  %v1593_v46 = vld [vmem:[%s1943_s1 + $0x158] sm:$0xff]  }
  0x15   : > { %1375 = vmatpush3.bf16.msra.mxu0 %v1557_v14  ;;  %v1590_v43 = vld [vmem:[%s1798_s6 + $0x40] ss:$28 sps:$4 sm:$0xff]   ;;  %v1592_v45 = vld [vmem:[%s1943_s1 + $0x110] sm:$0xff]   ;;  %v1603_v54 = vld [vmem:[%s1943_s1 + $0x188] sm:$0xff]  }
  0x16   : > { %1415 = vmatpush3.bf16.msra.mxu1 %v1558_v15  ;;  %1376 = vmatprep.subr.bf16.mxu0 %v1559_v16  ;;  %v1594_v47 = vld [vmem:[%s1943_s1 + $0x180] sm:$0xff]   ;;  %v1595_v48 = vld [vmem:[%s1943_s1 + $0x118] sm:$0xff]   ;;  %v1596_v49 = vld [vmem:[%s1798_s6 + $0x74] ss:$28 sps:$4 sm:$0xff]  }
  0x17   : > { %1416 = vmatprep.subr.bf16.mxu1 %v1560_v17  ;;  %v1598_v50 = vld [vmem:[%s1798_s6 + $0x7c] ss:$28 sps:$4 sm:$0xff]   ;;  %v1600_v51 = vld [vmem:[%s1798_s6 + $0x70] ss:$28 sps:$4 sm:$0xff]   ;;  %v1602_v53 = vld [vmem:[%s1943_s1 + $0x160] sm:$0xff]  }
  0x18   : > { %v1601_v52 = vld [vmem:[%s1798_s6 + $0x78] ss:$28 sps:$4 sm:$0xff]   ;;  %v1604_v55 = vld [vmem:[%s1943_s1 + $0x120] sm:$0xff]   ;;  %v1605_v56 = vld [vmem:[%s1943_s1 + $0x168] sm:$0xff]  }
  0x19   : > { %1377 = vmatpush3.bf16.msra.mxu0 %v1561_v18  ;;  %v1606_v57 = vld [vmem:[%s1943_s1 + $0x190] sm:$0xff]   ;;  %v1607_v58 = vld [vmem:[%s1943_s1 + $0x128] sm:$0xff]   ;;  %v1615_v0 = vld [vmem:[%s1943_s1 + $0x198] sm:$0xff]  }
  0x1a   : > { %1417 = vmatpush3.bf16.msra.mxu1 %v1562_v19  ;;  %1378 = vmatprep.subr.bf16.mxu0 %v1563_v20  ;;  %v1608_v59 = vld [vmem:[%s1798_s6 + $0xac] ss:$28 sps:$4 sm:$0xff]   ;;  %v1610_v60 = vld [vmem:[%s1798_s6 + $0xb4] ss:$28 sps:$4 sm:$0xff]   ;;  %v1617_v2 = vld [vmem:[%s1943_s1 + $0x178] sm:$0xff]  }
  0x1b   : > { %1418 = vmatprep.subr.bf16.mxu1 %v1564_v21  ;;  %v1612_v61 = vld [vmem:[%s1798_s6 + $0xa8] ss:$28 sps:$4 sm:$0xff]   ;;  %v1613_v62 = vld [vmem:[%s1798_s6 + $0xb0] ss:$28 sps:$4 sm:$0xff]   ;;  %v1619_v4 = vld [vmem:[%s1943_s1 + $0x138] sm:$0xff]  }
  0x1c   : > { %v1614_v63 = vld [vmem:[%s1943_s1 + $0x170] sm:$0xff]   ;;  %v1618_v3 = vld [vmem:[%s1943_s1 + $0x1a0] sm:$0xff]   ;;  %v1623_v7 = vld [vmem:[%s1943_s1 + $0x1a8] sm:$0xff]  }
  0x1d   : > { %1379 = vmatpush3.bf16.msra.mxu0 %v1565_v22  ;;  %v1616_v1 = vld [vmem:[%s1943_s1 + $0x130] sm:$0xff]   ;;  %v1626_v9 = vld [vmem:[%s1798_s6 + $0x4c] ss:$28 sps:$4 sm:$0xff]   ;;  %v1629_v13 = vld [vmem:[%s1798_s6 + $0x84] ss:$28 sps:$4 sm:$0xff]  }
  0x1e   : > { %1419 = vmatpush3.bf16.msra.mxu1 %v1566_v23  ;;  %1380 = vmatprep.subr.bf16.mxu0 %v1567_v24  ;;  %v1620_v5 = vld [vmem:[%s1798_s6 + $0x10] ss:$28 sps:$4 sm:$0xff]   ;;  %v1624_v8 = vld [vmem:[%s1798_s6 + $0x18] ss:$28 sps:$4 sm:$0xff]   ;;  %v1632_v11 = vld [vmem:[%s1798_s6 + $0x88] ss:$28 sps:$4 sm:$0xff]  }
  0x1f   : > { %1420 = vmatprep.subr.bf16.mxu1 %v1568_v25  ;;  %v1622_v6 = vld [vmem:[%s1798_s6 + $0x14] ss:$28 sps:$4 sm:$0xff]   ;;  %v1628_v12 = vld [vmem:[%s1798_s6 + $0x48] ss:$28 sps:$4 sm:$0xff]   ;;  %v1633_v14 = vld [vmem:[%s1798_s6 + $0xc0] ss:$28 sps:$4 sm:$0xff]  }
  0x20   : > { %v1625_v10 = vld [vmem:[%s1798_s6 + $0x50] ss:$28 sps:$4 sm:$0xff]   ;;  %v1631_v15 = vld [vmem:[%s1798_s6 + $0x80] ss:$28 sps:$4 sm:$0xff]   ;;  %v1636_v17 = vld [vmem:[%s1798_s6 + $0xb8] ss:$28 sps:$4 sm:$0xff]  }
  0x21   : > { %1381 = vmatpush3.bf16.msra.mxu0 %v1569_v26  ;;  %v1634_v16 = vld [vmem:[%s1798_s6 + $0xbc] ss:$28 sps:$4 sm:$0xff]  }
  0x22   : > { %1421 = vmatpush3.bf16.msra.mxu1 %v1570_v27  ;;  %1382 = vmatprep.subr.bf16.mxu0 %v1571_v28 }
  0x23   : > { %1422 = vmatprep.subr.bf16.mxu1 %v1572_v29 }
  0x25   : > { %1383 = vmatpush3.bf16.msra.mxu0 %v1573_v30 }
  0x26   : > { %1423 = vmatpush3.bf16.msra.mxu1 %v1574_v31  ;;  %1448 = vmatprep.subr.bf16.mxu0 %v1581_v36 }
  0x27   : > { %1498 = vmatprep.subr.bf16.mxu1 %v1594_v47 }
  0x28   : > { %898 = vmatmul.mubr.bf16.vlgmr.msra.gmra.mrb[0].mxu0 %v1575_v32 }
  0x29   : > { %963 = vmatmul.mubr.bf16.vlgmr.msra.gmra.mrb[0].mxu1 %v1578_v34  ;;  %1449 = vmatpush3.bf16.msra.mxu0 %v1582_v37 }
  0x2a   : > { %1450 = vmatprep.subr.bf16.mxu0 %v1583_v38  ;;  %905 = vmatprep.mubr.bf16.mxu0 %v1585_v40 }
  0x2b   : > { %970 = vmatprep.mubr.bf16.mxu1 %v1587_v41  ;;  %1499 = vmatpush3.bf16.msra.mxu1 %v1594_v47 }
  0x2c   : > { %1500 = vmatprep.subr.bf16.mxu1 %v1603_v54 }
  0x2d   : > { %1451 = vmatpush3.bf16.msra.mxu0 %v1584_v39 }
  0x2e   : > { %1452 = vmatprep.subr.bf16.mxu0 %v1591_v44 }
  0x2f   : > { %1501 = vmatpush3.bf16.msra.mxu1 %v1603_v54 }
  0x30   : > { %906 = vmatmul.mubr.bf16.gmra.mrb[4].mxu0 %v1589_v42  ;;  %1502 = vmatprep.subr.bf16.mxu1 %v1606_v57 }
  0x31   : > { %971 = vmatmul.mubr.bf16.gmra.mrb[4].mxu1 %v1590_v43  ;;  %1453 = vmatpush3.bf16.msra.mxu0 %v1592_v45 }
  0x32   : > { %1454 = vmatprep.subr.bf16.mxu0 %v1593_v46  ;;  %913 = vmatprep.mubr.bf16.mxu0 %v1596_v49 }
  0x33   : > { %978 = vmatprep.mubr.bf16.mxu1 %v1598_v50  ;;  %1503 = vmatpush3.bf16.msra.mxu1 %v1606_v57 }
  0x34   : > { %1504 = vmatprep.subr.bf16.mxu1 %v1615_v0 }
  0x35   : > { %1455 = vmatpush3.bf16.msra.mxu0 %v1595_v48 }
  0x36   : > { %1456 = vmatprep.subr.bf16.mxu0 %v1602_v53 }
  0x37   : > { %1505 = vmatpush3.bf16.msra.mxu1 %v1615_v0 }
  0x38   : > { %914 = vmatmul.mubr.bf16.gmra.mrb[8].mxu0 %v1600_v51  ;;  %1506 = vmatprep.subr.bf16.mxu1 %v1618_v3 }
  0x39   : > { %979 = vmatmul.mubr.bf16.gmra.mrb[8].mxu1 %v1601_v52  ;;  %1457 = vmatpush3.bf16.msra.mxu0 %v1604_v55 }
  0x3a   : > { %1458 = vmatprep.subr.bf16.mxu0 %v1605_v56  ;;  %921 = vmatprep.mubr.bf16.mxu0 %v1608_v59 }
  0x3b   : > { %986 = vmatprep.mubr.bf16.mxu1 %v1610_v60  ;;  %1507 = vmatpush3.bf16.msra.mxu1 %v1618_v3 }
  0x3c   : > { %1508 = vmatprep.subr.bf16.mxu1 %v1623_v7 }
  0x3d   : > { %1459 = vmatpush3.bf16.msra.mxu0 %v1607_v58 }
  0x3e   : > { %1460 = vmatprep.subr.bf16.mxu0 %v1614_v63 }
  0x3f   : > { %1509 = vmatpush3.bf16.msra.mxu1 %v1623_v7 }
  0x40   : > { %922 = vmatmul.mubr.bf16.gmra.mrb[12].mxu0 %v1612_v61 }
  0x41   : > { %987 = vmatmul.mubr.bf16.gmra.mrb[12].mxu1 %v1613_v62  ;;  %1461 = vmatpush3.bf16.msra.mxu0 %v1616_v1 }
  0x42   : > { %1462 = vmatprep.subr.bf16.mxu0 %v1617_v2  ;;  %1027 = vmatprep.mubr.bf16.mxu0 %v1622_v6 }
  0x43   : > { %1510 = vmatprep.mubr.msk.bf16.mxu1 %vm852_vm0, %v1624_v8 }
  0x45   : > { %1463 = vmatpush3.bf16.msra.mxu0 %v1619_v4 }
  0x48   : > { %1028 = vmatmul.mubr.bf16.vlgmr.msra.gmra.mrb[16].mxu0 %v1620_v5 }
  0x49   : > { %1035 = vmatprep.mubr.bf16.mxu0 %v1626_v9  ;;  %1511 = vmatmul.mubr.msk.bf16.vlgmr.msra.gmra.mrb[16].mxu1 %vm852_vm0, %v1625_v10 }
  0x4a   : > { %1514 = vmatprep.mubr.msk.bf16.mxu1 %vm852_vm0, %v1632_v11 }
  0x50   : > { %1036 = vmatmul.mubr.bf16.gmra.mrb[20].mxu0 %v1628_v12 }
  0x51   : > { %1043 = vmatprep.mubr.bf16.mxu0 %v1629_v13  ;;  %1515 = vmatmul.mubr.msk.bf16.gmra.mrb[20].mxu1 %vm852_vm0, %v1633_v14 }
  0x58   : > { %1044 = vmatmul.mubr.bf16.gmra.mrb[24].mxu0 %v1631_v15 }
  0x59   : > { %1051 = vmatprep.mubr.bf16.mxu0 %v1634_v16 }
  0x60   : > { %1052 = vmatmul.mubr.bf16.gmra.mrb[28].mxu0 %v1636_v17 }
  0xfb   : > { %v1384_v18 = vpop.f32.mrb[0].mxu0 }
  0xfc   : > { %v1424_v19 = vpop.f32.mrb[0].mxu1  ;;  %v1385_v20 = vpop.f32.mrb[1].mxu0 }
  0xfd   : > { %v1386_v21 = vadd.f32 %v1385_v20, %v1384_v18  ;;  %v1425_v22 = vpop.f32.mrb[1].mxu1  ;;  %v1387_v23 = vpop.f32.mrb[2].mxu0 }
  0xfe   : > { %v1426_v24 = vadd.f32 %v1425_v22, %v1424_v19  ;;  %v1427_v25 = vpop.f32.mrb[2].mxu1  ;;  %v1388_v26 = vpop.f32.mrb[3].mxu0  ;;  %v1365_v19 = vld [vmem:[%s1944_s2] ss:$0 sm:$0xff] }
  0xff   : > { %v1389_v27 = vadd.f32 %v1388_v26, %v1387_v23  ;;  %v1428_v28 = vpop.f32.mrb[3].mxu1 }
 0x100   : > { %v965_v29 = vadd.f32 %v1426_v24, %v1386_v21  ;;  %v1429_v30 = vadd.f32 %v1428_v28, %v1427_v25 }
 0x102   : > { %v968_v31 = vadd.f32 %v1429_v30, %v1389_v27 }
 0x103   : > { %v1390_v32 = vpop.f32.mrb[4].mxu0 }
 0x104   : > { %v1430_v33 = vpop.f32.mrb[4].mxu1  ;;  %v1391_v34 = vpop.f32.mrb[5].mxu0 }
 0x105   : > { %v1392_v35 = vadd.f32 %v1391_v34, %v1390_v32  ;;  %v1431_v36 = vpop.f32.mrb[5].mxu1  ;;  %v1393_v37 = vpop.f32.mrb[6].mxu0 }
 0x106   : > { %v1432_v38 = vadd.f32 %v1431_v36, %v1430_v33  ;;  %v1433_v39 = vpop.f32.mrb[6].mxu1  ;;  %v1394_v40 = vpop.f32.mrb[7].mxu0 }
 0x107   : > { %v1395_v41 = vadd.f32 %v1394_v40, %v1393_v37  ;;  %v1434_v42 = vpop.f32.mrb[7].mxu1 }
 0x108   : > { %v973_v43 = vadd.f32 %v1432_v38, %v1392_v35  ;;  %v1435_v44 = vadd.f32 %v1434_v42, %v1433_v39 }
 0x10a   : > { %v976_v45 = vadd.f32 %v1435_v44, %v1395_v41 }
 0x10b   : > { %v1396_v46 = vpop.f32.mrb[8].mxu0 }
 0x10c   : > { %v1436_v47 = vpop.f32.mrb[8].mxu1  ;;  %v1397_v48 = vpop.f32.mrb[9].mxu0 }
 0x10d   : > { %v1398_v49 = vadd.f32 %v1397_v48, %v1396_v46  ;;  %v1437_v50 = vpop.f32.mrb[9].mxu1  ;;  %v1399_v51 = vpop.f32.mrb[10].mxu0 }
 0x10e   : > { %v1438_v52 = vadd.f32 %v1437_v50, %v1436_v47  ;;  %v1439_v53 = vpop.f32.mrb[10].mxu1  ;;  %v1400_v54 = vpop.f32.mrb[11].mxu0 }
 0x10f   : > { %v1401_v55 = vadd.f32 %v1400_v54, %v1399_v51  ;;  %v1440_v56 = vpop.f32.mrb[11].mxu1 }
 0x110   : > { %v1904_v57 = vadd.f32 %v1438_v52, %v1398_v49  ;;  %v1441_v58 = vadd.f32 %v1440_v56, %v1439_v53 }
 0x112   : > { %v1906_v59 = vadd.f32 %v1441_v58, %v1401_v55 }
 0x113   : > { %v1402_v60 = vpop.f32.mrb[12].mxu0 }
 0x114   : > { %v1442_v61 = vpop.f32.mrb[12].mxu1  ;;  %v1403_v62 = vpop.f32.mrb[13].mxu0 }
 0x115   : > { %v1404_v63 = vadd.f32 %v1403_v62, %v1402_v60  ;;  %v1443_v0 = vpop.f32.mrb[13].mxu1  ;;  %v1405_v1 = vpop.f32.mrb[14].mxu0 }
 0x116   : > { %v1444_v2 = vadd.f32 %v1443_v0, %v1442_v61  ;;  %v1445_v3 = vpop.f32.mrb[14].mxu1  ;;  %v1406_v4 = vpop.f32.mrb[15].mxu0 }
 0x117   : > { %v1407_v5 = vadd.f32 %v1406_v4, %v1405_v1  ;;  %v1446_v6 = vpop.f32.mrb[15].mxu1 }
 0x118   : > { %v1908_v7 = vadd.f32 %v1444_v2, %v1404_v63  ;;  %v1447_v8 = vadd.f32 %v1446_v6, %v1445_v3 }
 0x11a   : > { %v1910_v9 = vadd.f32 %v1447_v8, %v1407_v5 }
 0x11b   : > { %v1464_v10 = vpop.f32.mrb[16].mxu0 }
 0x11c   : > { %v1465_v11 = vpop.f32.mrb[17].mxu0  ;;  %v1512_v16 = vpop.f32.mrb[16].mxu1 }
 0x11d   : > { %v1466_v12 = vadd.f32 %v1465_v11, %v1464_v10  ;;  %v1467_v13 = vpop.f32.mrb[18].mxu0  ;;  %v1094_v18 = vpop.f32.mrb[17].mxu1 }
 0x11e   : > { %v1468_v14 = vpop.f32.mrb[19].mxu0  ;;  %v1513_v21 = vpop.f32.mrb[18].mxu1 }
 0x11f   : > { %v1469_v15 = vadd.f32 %v1468_v14, %v1467_v13  ;;  %v1030_v17 = vadd.f32 %v1466_v12, %v965_v29  ;;  %v1097_v23 = vpop.f32.mrb[19].mxu1 }
 0x121   : > { %v1095_v20 = vadd.f32 %v1094_v18, %v1030_v17  ;;  %v1033_v22 = vadd.f32 %v1469_v15, %v968_v31 }
 0x123   : > { %v1159_v24 = vadd.f32 %v1365_v19, %v1095_v20  ;;  %v1098_v25 = vadd.f32 %v1097_v23, %v1033_v22  ;;  %v1470_v26 = vpop.f32.mrb[20].mxu0 }
 0x124   : > { %v1471_v27 = vpop.f32.mrb[21].mxu0  ;;  %v1516_v36 = vpop.f32.mrb[20].mxu1 }
 0x125   : > { %v1167_v28 = vmax.f32 %v1159_v24, 0.0  ;;  %v1160_v29 = vadd.f32 %v1365_v19, %v1098_v25  ;;  %v1472_v30 = vadd.f32 %v1471_v27, %v1470_v26  ;;  %v1473_v32 = vpop.f32.mrb[22].mxu0  ;;  %v1110_v37 = vpop.f32.mrb[21].mxu1 }
 0x126   : > { %v1474_v33 = vpop.f32.mrb[23].mxu0  ;;  %v1517_v40 = vpop.f32.mrb[22].mxu1 }
 0x127   : > { %1175 = vst [vmem:[%s1919_s19] sm:$0xff] %v1167_v28  ;;  %v1168_v34 = vmax.f32 %v1160_v29, 0.0  ;;  %v1038_v31 = vadd.f32 %v1472_v30, %v973_v43  ;;  %v1475_v35 = vadd.f32 %v1474_v33, %v1473_v32  ;;  %v1113_v41 = vpop.f32.mrb[23].mxu1 }
 0x129   : > { %1176 = vst [vmem:[%s1919_s19 + $0x8] sm:$0xff] %v1168_v34  ;;  %v1103_v38 = vadd.f32 %v1512_v16, %v1038_v31  ;;  %v1041_v39 = vadd.f32 %v1475_v35, %v976_v45 }
 0x12b   : > { %v1161_v42 = vadd.f32 %v1365_v19, %v1103_v38  ;;  %v1106_v44 = vadd.f32 %v1513_v21, %v1041_v39  ;;  %v1476_v46 = vpop.f32.mrb[24].mxu0 }
 0x12c   : > { %v1477_v47 = vpop.f32.mrb[25].mxu0 }
 0x12d   : > { %v1169_v48 = vmax.f32 %v1161_v42, 0.0  ;;  %v1162_v49 = vadd.f32 %v1365_v19, %v1106_v44  ;;  %v1478_v50 = vadd.f32 %v1477_v47, %v1476_v46  ;;  %v1479_v51 = vpop.f32.mrb[26].mxu0 }
 0x12e   : > { %v1480_v52 = vpop.f32.mrb[27].mxu0 }
 0x12f   : > { %1177 = vst [vmem:[%s1919_s19 + $0x10] sm:$0xff] %v1169_v48  ;;  %v1170_v43 = vmax.f32 %v1162_v49, 0.0  ;;  %v1481_v53 = vadd.f32 %v1480_v52, %v1479_v51  ;;  %v1046_v54 = vadd.f32 %v1478_v50, %v1904_v57 }
 0x131   : > { %1178 = vst [vmem:[%s1919_s19 + $0x18] sm:$0xff] %v1170_v43  ;;  %v1111_v45 = vadd.f32 %v1110_v37, %v1046_v54  ;;  %v1049_v55 = vadd.f32 %v1481_v53, %v1906_v59 }
 0x133   : > { %v1163_v56 = vadd.f32 %v1365_v19, %v1111_v45  ;;  %v1114_v58 = vadd.f32 %v1113_v41, %v1049_v55  ;;  %v1482_v60 = vpop.f32.mrb[28].mxu0 }
 0x134   : > { %v1483_v61 = vpop.f32.mrb[29].mxu0 }
 0x135   : > { %v1171_v62 = vmax.f32 %v1163_v56, 0.0  ;;  %v1164_v63 = vadd.f32 %v1365_v19, %v1114_v58  ;;  %v1484_v0 = vadd.f32 %v1483_v61, %v1482_v60  ;;  %v1485_v1 = vpop.f32.mrb[30].mxu0 }
 0x136   : > { %v1486_v2 = vpop.f32.mrb[31].mxu0 }
 0x137   : > { %1179 = vst [vmem:[%s1919_s19 + $0x20] sm:$0xff] %v1171_v62  ;;  %v1172_v3 = vmax.f32 %v1164_v63, 0.0  ;;  %v1054_v57 = vadd.f32 %v1484_v0, %v1908_v7  ;;  %v1487_v4 = vadd.f32 %v1486_v2, %v1485_v1 }
 0x139   : > { %1180 = vst [vmem:[%s1919_s19 + $0x28] sm:$0xff] %v1172_v3  ;;  %v1119_v5 = vadd.f32 %v1516_v36, %v1054_v57  ;;  %v1057_v59 = vadd.f32 %v1487_v4, %v1910_v9 }
 0x13b   : > { %v1165_v6 = vadd.f32 %v1365_v19, %v1119_v5  ;;  %v1122_v8 = vadd.f32 %v1517_v40, %v1057_v59 }
 0x13d   : > { %v1173_v10 = vmax.f32 %v1165_v6, 0.0  ;;  %v1166_v11 = vadd.f32 %v1365_v19, %v1122_v8 }
 0x13f   : > { %1181 = vst [vmem:[%s1919_s19 + $0x30] sm:$0xff] %v1173_v10  ;;  %v1174_v12 = vmax.f32 %v1166_v11, 0.0 }
 0x141   : > { %1182 = vst [vmem:[%s1919_s19 + $0x38] sm:$0xff] %v1174_v12 }
 0x142 PF: > { %s13_s14 = sadd.s32 1, %s1659_s14   ;;  %s1946_s12 = smov %s1655_s13 }
 0x143   : > { %p10_p5 = scmp.ge.s32.totalorder %s13_s14, 4   ;;  %s1947_s13 = smov %s1949_s15 }
 0x145   :  { %12 = sbr.rel (!%p10_p5) target bundleno = 2 (0x2), region = 73 }

// kernel: inception_b_forward.5
= control target key start
LH: loop header
LB: loop body
LE: loop exit
PB: predicated region body
PF: predicated region fallthrough
CT: control target
= control target key end

     0   :  { %s907_s12 = smov 0   ;;  %s909_s13 = smov 0   ;;  %s1029_s0 = inlined_call_operand.vmem [shape: bf16[128,36], index: 0, kind: input, shape index: {}]   ;;  %s1030_s1 = inlined_call_operand.vmem [shape: bf16[36,384], index: 1, kind: input, shape index: {}]   ;;  %s1031_s2 = inlined_call_operand.vmem [shape: f32[1,384], index: 2, kind: input, shape index: {}]   ;;  %s1032_s3 = inlined_call_operand.vmem [shape: f32[128,384], index: 3, kind: output, shape index: {}]  }
   0x1   :  { %s911_s14 = smov 0  }
   0x2 LB: > { %s25_s15 = sadd.s32 1, %s880_s13  ;;  %p770_p0 = scmp.ge.s32.totalorder %s884_s14, 1  ;;  %s884_s14 = sphi %s911_s14, %s13_s14   ;;  %s880_s13 = sphi %s909_s13, %s1034_s13   ;;  %s876_s12 = sphi %s907_s12, %s1033_s12  }
   0x3   : > { %p27_p1 = scmp.ge.s32.totalorder %s25_s15, 2  ;;  %p167_p2 = scmp.lt.s32.totalorder %s884_s14, 3 }
   0x5   : > { %s1036_s15 = smov (%p27_p1, %s25_s15), 0  ;;  %p168_p3 = pnand %p770_p0, %p167_p2 }
   0x6   : > { %v847_v0 = vld [vmem:[%s1030_s1 + $0x4] ss:$12 sps:$4 sm:$0xff] (!%p168_p3)   ;;  %v849_v1 = vld [vmem:[%s1030_s1] ss:$12 sps:$4 sm:$0xff] (!%p168_p3)   ;;  %v886_v2 = vmov (!%p168_p3), 0   ;;  %s771_s20 = sshll.u32 (!%p168_p3), %s876_s12, 3  ;;  %v593_v17 = vlaneseq (!%p168_p3) }
   0x7   : > { %171 = sbr.rel (%p168_p3) target bundleno = 263 (0x107), region = 32  ;;  %410 = vmatprep.mubr.bf16.mxu0 (!%p168_p3), %v886_v2  ;;  %378 = vmatprep.subr.bf16.mxu0 (!%p168_p3), %v847_v0  ;;  %v850_v3 = vld [vmem:[%s1030_s1 + $0x1c] ss:$12 sps:$4 sm:$0xff] (!%p168_p3)   ;;  %v852_v4 = vld [vmem:[%s1030_s1 + $0x18] ss:$12 sps:$4 sm:$0xff] (!%p168_p3)   ;;  %p202_p4 = scmp.lt.s32.totalorder (!%p168_p3), %s771_s20, 15 }
   0x8   : > { %v293_v5 = vld [vmem:[%s1030_s1 + $0x30] sm:$0x33] (!%p168_p3)  ;;  %379 = vmatpush1.bf16.msra.mxu0 (!%p168_p3), %v849_v1  ;;  %vm368_vm0 = vcmask (!%p168_p3), 1041408   ;;  %v857_v9 = vld [vmem:[%s1030_s1 + $0x20] ss:$12 sps:$4 sm:$0xff] (!%p168_p3)   ;;  %vm355_vm1 = vcmask (!%p168_p3), 293888  }
   0x9   : > { %380 = vmatprep.subr.bf16.mxu0 (!%p168_p3), %v850_v3  ;;  %v786_v6 = vcombine.high (!%p168_p3), %v293_v5, %v293_v5  ;;  %v785_v7 = vcombine.low (!%p168_p3), %v293_v5, %v293_v5  ;;  %v856_v8 = vld [vmem:[%s1030_s1 + $0x8] ss:$12 sps:$4 sm:$0xff] (!%p168_p3)   ;;  %v859_v11 = vld [vmem:[%s1030_s1 + $0x38] ss:$0 sps:$4 sm:$0x33] (!%p168_p3)   ;;  %v594_v18 = vshrl.u32 (!%p168_p3), %v593_v17, 7 }
   0xa   : > { %806 = vmatprep.subr.bf16.mxu1 (!%p168_p3), %v856_v8  ;;  %v376_v13 = vsel (!%p168_p3), %vm368_vm0, %v859_v11, 0  ;;  %v591_v20 = vld [vmem:[%s1031_s2] sm:$0x7] (!%p168_p3) }
   0xb   : > { %807 = vmatpush3.bf16.msra.mxu1 (!%p168_p3), %v856_v8  ;;  %v370_v10 = vsel (!%p168_p3), %vm368_vm0, %v785_v7, 0  ;;  %v595_v19 = vsub.s32 (!%p168_p3), 0, %v594_v18  ;;  %v599_v21 = vsub.s32 (!%p168_p3), 1, %v594_v18  ;;  %v603_v23 = vsub.s32 (!%p168_p3), 2, %v594_v18 }
   0xc   : > { %381 = vmatpush1.bf16.msra.mxu0 (!%p168_p3), %v852_v4  ;;  %808 = vmatprep.subr.bf16.mxu1 (!%p168_p3), %v857_v9 }
   0xd   : > { %788 = vmatprep.subr.msk.bf16.mxu0 (!%p168_p3), %vm368_vm0, %v786_v6  ;;  %v970_v22 = vrot.slane (!%p168_p3), %v591_v20, %v595_v19  ;;  %v973_v24 = vrot.slane (!%p168_p3), %v591_v20, %v599_v21  ;;  %v604_v28 = vrot.slane (!%p168_p3), %v591_v20, %v603_v23 }
   0xe   : > { %s1038_s20 = smov (!%p202_p4, %s771_s20), 15 }
   0xf   : > { %s772_s4 = sshll.u32 %s1038_s20, 2  ;;  %809 = vmatpush3.bf16.msra.mxu1 %v857_v9  ;;  %s821_s12 = smul.u32 24, %s1038_s20 }
  0x10   : > { %s208_s7 = scalar_lea.vmem %s1029_s0, %s772_s4  ;;  %383 = vmatpush1.bf16.msra.mxu0 %v370_v10  ;;  %820 = vmatprep.subr.msk.bf16.mxu1 %vm368_vm0, %v859_v11 }
  0x11   : > { %v855_v12 = vld [vmem:[%s208_s7] sm:$0xff]   ;;  %v858_v14 = vld [vmem:[%s208_s7 + $0x8] sm:$0xff]   ;;  %v860_v15 = vld [vmem:[%s208_s7 + $0x10] sm:$0xff]   ;;  %s979_s18 = scalar_lea.vmem %s1032_s3, %s821_s12 }
  0x12   : > { %812 = vmatprep.mubr.msk.bf16.mxu1 %vm355_vm1, %v855_v12  ;;  %v861_v16 = vld [vmem:[%s208_s7 + $0x18] sm:$0xff]  }
  0x13   : > { %789 = vmatmul.mubr.msk.bf16.vlgmr.msra.gmra.mrb[0].mxu0 %vm355_vm1, %v855_v12  ;;  %811 = vmatpush3.bf16.msra.mxu1 %v376_v13 }
  0x14   : > { %420 = vmatprep.mubr.bf16.mxu0 %v886_v2 }
  0x16   : > { %813 = vmatmul.mubr.msk.bf16.vlgmr.msra.gmra.mrb[0].mxu1 %vm355_vm1, %v858_v14 }
  0x17   : > { %816 = vmatprep.mubr.msk.bf16.mxu1 %vm355_vm1, %v860_v15 }
  0x1b   : > { %790 = vmatmul.mubr.msk.bf16.gmra.mrb[4].mxu0 %vm355_vm1, %v858_v14 }
  0x1c   : > { %430 = vmatprep.mubr.bf16.mxu0 %v886_v2 }
  0x1e   : > { %817 = vmatmul.mubr.msk.bf16.gmra.mrb[4].mxu1 %vm355_vm1, %v861_v16 }
  0x23   : > { %791 = vmatmul.mubr.msk.bf16.gmra.mrb[8].mxu0 %vm355_vm1, %v860_v15 }
  0x24   : > { %440 = vmatprep.mubr.bf16.mxu0 %v886_v2 }
  0x2b   : > { %792 = vmatmul.mubr.msk.bf16.gmra.mrb[12].mxu0 %vm355_vm1, %v861_v16 }
  0xe6   : > { %v412_v25 = vpop.f32.mrb[0].mxu0 }
  0xe7   : > { %v608_v26 = vadd.f32 %v970_v22, %v412_v25  ;;  %v414_v27 = vpop.f32.mrb[1].mxu0 }
  0xe8   : > { %v609_v29 = vadd.f32 %v973_v24, %v414_v27  ;;  %v416_v30 = vpop.f32.mrb[2].mxu0 }
  0xe9   : > { %v632_v31 = vmax.f32 %v608_v26, 0.0  ;;  %v611_v32 = vadd.f32 %v970_v22, %v416_v30  ;;  %v418_v33 = vpop.f32.mrb[3].mxu0  ;;  %v814_v36 = vpop.f32.mrb[0].mxu1 }
  0xea   : > { %v633_v34 = vmax.f32 %v609_v29, 0.0  ;;  %v612_v35 = vadd.f32 %v973_v24, %v418_v33  ;;  %v616_v38 = vadd.f32 %v814_v36, %v604_v28  ;;  %v485_v39 = vpop.f32.mrb[1].mxu1 }
  0xeb   : > { %656 = vst [vmem:[%s979_s18] sm:$0xff] %v632_v31  ;;  %v635_v37 = vmax.f32 %v611_v32, 0.0  ;;  %v610_v41 = vadd.f32 %v604_v28, %v485_v39  ;;  %v815_v42 = vpop.f32.mrb[2].mxu1 }
  0xec   : > { %657 = vst [vmem:[%s979_s18 + $0x8] sm:$0xff] %v633_v34  ;;  %v636_v40 = vmax.f32 %v612_v35, 0.0  ;;  %v640_v43 = vmax.f32 %v616_v38, 0.0  ;;  %v619_v44 = vadd.f32 %v815_v42, %v604_v28  ;;  %v488_v45 = vpop.f32.mrb[3].mxu1 }
  0xed   : > { %659 = vst [vmem:[%s979_s18 + $0x18] sm:$0xff] %v635_v37  ;;  %v634_v47 = vmax.f32 %v610_v41, 0.0  ;;  %v613_v48 = vadd.f32 %v604_v28, %v488_v45 }
  0xee   : > { %660 = vst [vmem:[%s979_s18 + $0x20] sm:$0xff] %v636_v40  ;;  %v422_v46 = vpop.f32.mrb[4].mxu0  ;;  %664 = vst [vmem:[%s979_s18 + $0x40] sm:$0xff] %v640_v43  ;;  %v643_v51 = vmax.f32 %v619_v44, 0.0 }
  0xef   : > { %v614_v49 = vadd.f32 %v970_v22, %v422_v46  ;;  %v424_v50 = vpop.f32.mrb[5].mxu0  ;;  %658 = vst [vmem:[%s979_s18 + $0x10] sm:$0xff] %v634_v47  ;;  %v637_v54 = vmax.f32 %v613_v48, 0.0 }
  0xf0   : > { %v615_v52 = vadd.f32 %v973_v24, %v424_v50  ;;  %v426_v53 = vpop.f32.mrb[6].mxu0  ;;  %667 = vst [vmem:[%s979_s18 + $0x58] sm:$0xff] %v643_v51 }
  0xf1   : > { %v638_v55 = vmax.f32 %v614_v49, 0.0  ;;  %v617_v56 = vadd.f32 %v970_v22, %v426_v53  ;;  %v428_v57 = vpop.f32.mrb[7].mxu0  ;;  %661 = vst [vmem:[%s979_s18 + $0x28] sm:$0xff] %v637_v54  ;;  %v818_v60 = vpop.f32.mrb[4].mxu1 }
  0xf2   : > { %v639_v58 = vmax.f32 %v615_v52, 0.0  ;;  %v618_v59 = vadd.f32 %v973_v24, %v428_v57  ;;  %v628_v62 = vadd.f32 %v818_v60, %v604_v28  ;;  %v501_v63 = vpop.f32.mrb[5].mxu1 }
  0xf3   : > { %662 = vst [vmem:[%s979_s18 + $0x30] sm:$0xff] %v638_v55  ;;  %v641_v61 = vmax.f32 %v617_v56, 0.0  ;;  %v622_v1 = vadd.f32 %v604_v28, %v501_v63  ;;  %v819_v2 = vpop.f32.mrb[6].mxu1 }
  0xf4   : > { %663 = vst [vmem:[%s979_s18 + $0x38] sm:$0xff] %v639_v58  ;;  %v642_v0 = vmax.f32 %v618_v59, 0.0  ;;  %v652_v3 = vmax.f32 %v628_v62, 0.0  ;;  %v631_v4 = vadd.f32 %v819_v2, %v604_v28  ;;  %v504_v5 = vpop.f32.mrb[7].mxu1 }
  0xf5   : > { %665 = vst [vmem:[%s979_s18 + $0x48] sm:$0xff] %v641_v61  ;;  %v646_v7 = vmax.f32 %v622_v1, 0.0  ;;  %v625_v8 = vadd.f32 %v604_v28, %v504_v5 }
  0xf6   : > { %666 = vst [vmem:[%s979_s18 + $0x50] sm:$0xff] %v642_v0  ;;  %v432_v6 = vpop.f32.mrb[8].mxu0  ;;  %676 = vst [vmem:[%s979_s18 + $0xa0] sm:$0xff] %v652_v3  ;;  %v655_v11 = vmax.f32 %v631_v4, 0.0 }
  0xf7   : > { %v620_v9 = vadd.f32 %v970_v22, %v432_v6  ;;  %v434_v10 = vpop.f32.mrb[9].mxu0  ;;  %670 = vst [vmem:[%s979_s18 + $0x70] sm:$0xff] %v646_v7  ;;  %v649_v14 = vmax.f32 %v625_v8, 0.0 }
  0xf8   : > { %v621_v12 = vadd.f32 %v973_v24, %v434_v10  ;;  %v436_v13 = vpop.f32.mrb[10].mxu0  ;;  %679 = vst [vmem:[%s979_s18 + $0xb8] sm:$0xff] %v655_v11 }
  0xf9   : > { %v644_v15 = vmax.f32 %v620_v9, 0.0  ;;  %v623_v16 = vadd.f32 %v970_v22, %v436_v13  ;;  %v438_v17 = vpop.f32.mrb[11].mxu0  ;;  %673 = vst [vmem:[%s979_s18 + $0x88] sm:$0xff] %v649_v14 }
  0xfa   : > { %v645_v18 = vmax.f32 %v621_v12, 0.0  ;;  %v624_v19 = vadd.f32 %v973_v24, %v438_v17 }
  0xfb   : > { %668 = vst [vmem:[%s979_s18 + $0x60] sm:$0xff] %v644_v15  ;;  %v647_v20 = vmax.f32 %v623_v16, 0.0 }
  0xfc   : > { %669 = vst [vmem:[%s979_s18 + $0x68] sm:$0xff] %v645_v18  ;;  %v648_v21 = vmax.f32 %v624_v19, 0.0 }
  0xfd   : > { %671 = vst [vmem:[%s979_s18 + $0x78] sm:$0xff] %v647_v20 }
  0xfe   : > { %672 = vst [vmem:[%s979_s18 + $0x80] sm:$0xff] %v648_v21  ;;  %v442_v23 = vpop.f32.mrb[12].mxu0 }
  0xff   : > { %v626_v25 = vadd.f32 %v970_v22, %v442_v23  ;;  %v444_v26 = vpop.f32.mrb[13].mxu0 }
 0x100   : > { %v627_v27 = vadd.f32 %v973_v24, %v444_v26  ;;  %v446_v28 = vpop.f32.mrb[14].mxu0 }
 0x101   : > { %v650_v29 = vmax.f32 %v626_v25, 0.0  ;;  %v629_v30 = vadd.f32 %v970_v22, %v446_v28  ;;  %v448_v31 = vpop.f32.mrb[15].mxu0 }
 0x102   : > { %v651_v32 = vmax.f32 %v627_v27, 0.0  ;;  %v630_v33 = vadd.f32 %v973_v24, %v448_v31 }
 0x103   : > { %674 = vst [vmem:[%s979_s18 + $0x90] sm:$0xff] %v650_v29  ;;  %v653_v34 = vmax.f32 %v629_v30, 0.0 }
 0x104   : > { %675 = vst [vmem:[%s979_s18 + $0x98] sm:$0xff] %v651_v32  ;;  %v654_v35 = vmax.f32 %v630_v33, 0.0 }
 0x105   : > { %677 = vst [vmem:[%s979_s18 + $0xa8] sm:$0xff] %v653_v34 }
 0x106   : > { %678 = vst [vmem:[%s979_s18 + $0xb0] sm:$0xff] %v654_v35 }
 0x107 PF: > { %s13_s14 = sadd.s32 1, %s884_s14   ;;  %s1033_s12 = smov %s880_s13 }
 0x108   : > { %p10_p5 = scmp.ge.s32.totalorder %s13_s14, 4   ;;  %s1034_s13 = smov %s1036_s15 }
 0x10a   :  { %12 = sbr.rel (!%p10_p5) target bundleno = 2 (0x2), region = 73 }

// kernel: inception_b_forward.9
= control target key start
LH: loop header
LB: loop body
LE: loop exit
PB: predicated region body
PF: predicated region fallthrough
CT: control target
= control target key end

     0   :  { %s371_s6 = smov 0   ;;  %s373_s7 = smov 0   ;;  %s466_s0 = inlined_call_operand.vmem [shape: f32[9,128,4], index: 0, kind: input, shape index: {}]   ;;  %s467_s1 = inlined_call_operand.vmem [shape: f32[128,4], index: 1, kind: output, shape index: {}]  }
   0x1   :  { %s375_s8 = smov 0   ;;  %s377_s9 = smov 0  }
   0x2   :  { %s379_s10 = smov 0  }
   0x3 LB: > { %s20_s11 = sadd.s32 1, %s350_s8  ;;  %s23_s12 = sadd.s32 1, %s354_s9  ;;  %s358_s10 = sphi %s379_s10, %s11_s10   ;;  %s354_s9 = sphi %s377_s9, %s471_s9   ;;  %s350_s8 = sphi %s375_s8, %s470_s8   ;;  %s346_s7 = sphi %s373_s7, %s469_s7   ;;  %s342_s6 = sphi %s371_s6, %s468_s6  }
   0x4   : > { %p21_p0 = scmp.ge.s32.totalorder %s20_s11, 9  ;;  %p270_p1 = scmp.ge.s32.totalorder %s358_s10, 1 }
   0x5   : > { %p106_p2 = scmp.lt.s32.totalorder %s358_s10, 19 }
   0x6   : > { %s473_s11 = smov (%p21_p0, %s20_s11), 0  ;;  %s475_s12 = smov (!%p21_p0, %s23_s12), %s354_s9 }
   0x7   : > { %p107_p3 = pnand %p270_p1, %p106_p2  ;;  %p25_p4 = scmp.ge.s32.totalorder %s475_s12, 2 }
   0x8   : > { %s271_s13 = sshll.u32 (!%p107_p3), %s346_s7, 3  ;;  %p131_p5 = scmp.lt.s32.totalorder (!%p107_p3), %s342_s6, 8 }
   0x9   : > { %s477_s12 = smov (%p25_p4, %s475_s12), 0  ;;  %110 = sbr.rel (%p107_p3) target bundleno = 34 (0x22), region = 24 }
   0xa   : > { %p133_p6 = scmp.lt.s32.totalorder (!%p107_p3), %s271_s13, 15  ;;  %p276_p7 = scmp.ne.s32.totalorder (!%p107_p3), %s342_s6, 0 }
  0x10   : > { %s132_s14 = scalar_select %p131_p5, %s342_s6, 8 }
  0x11   : > { %s479_s13 = smov (!%p133_p6, %s271_s13), 15  ;;  %149 = sbr.rel (%p276_p7) target bundleno = 24 (0x18), region = 28 }
  0x12   : > { %s272_s15 = sshll.u32 %s132_s14, 4  ;;  %s275_s17 = sshll.u32 %s479_s13, 3  ;;  %vm150_vm0 = vcmask (!%p276_p7), 31744   ;;  %v360_v0 = vmov (!%p276_p7), -inf  }
  0x13   : > { %s136_s16 = sadd.s32 %s272_s15, %s479_s13  ;;  %s404_s21 = scalar_lea.vmem %s467_s1, %s275_s17 }
  0x14   : > { %s273_s18 = sshll.u32 %s136_s16, 3  ;;  %151 = vst.msk [vmem:[%s404_s21] sm:$0xff] (!%p276_p7), %vm150_vm0, %v360_v0  ;;  %152 = vst.msk [vmem:[%s404_s21 + $0x8] sm:$0xff] (!%p276_p7), %vm150_vm0, %v360_v0 }
  0x15   : > { %s409_s24 = scalar_lea.vmem %s466_s0, %s273_s18  ;;  %153 = vst.msk [vmem:[%s404_s21 + $0x10] sm:$0xff] (!%p276_p7), %vm150_vm0, %v360_v0  ;;  %154 = vst.msk [vmem:[%s404_s21 + $0x18] sm:$0xff] (!%p276_p7), %vm150_vm0, %v360_v0 }
  0x16   : > { %155 = vst.msk [vmem:[%s404_s21 + $0x20] sm:$0xff] (!%p276_p7), %vm150_vm0, %v360_v0  ;;  %156 = vst.msk [vmem:[%s404_s21 + $0x28] sm:$0xff] (!%p276_p7), %vm150_vm0, %v360_v0 }
  0x17   : > { %157 = vst.msk [vmem:[%s404_s21 + $0x30] sm:$0xff] (!%p276_p7), %vm150_vm0, %v360_v0  ;;  %158 = vst.msk [vmem:[%s404_s21 + $0x38] sm:$0xff] (!%p276_p7), %vm150_vm0, %v360_v0 }
  0x18 PF: > { %v167_v2 = vld [vmem:[%s409_s24] sm:$0xff]  ;;  %vm183_vm1 = vcmask 31744   ;;  %v168_v5 = vld [vmem:[%s409_s24 + $0x8] sm:$0xff]  ;;  %v169_v7 = vld [vmem:[%s409_s24 + $0x10] sm:$0xff] }
  0x19   : > { %v170_v11 = vld [vmem:[%s409_s24 + $0x18] sm:$0xff]  ;;  %v171_v14 = vld [vmem:[%s409_s24 + $0x20] sm:$0xff]  ;;  %v172_v16 = vld [vmem:[%s409_s24 + $0x28] sm:$0xff] }
  0x1a   : > { %v173_v20 = vld [vmem:[%s409_s24 + $0x30] sm:$0xff]  ;;  %v174_v23 = vld [vmem:[%s409_s24 + $0x38] sm:$0xff] }
  0x1b   : > { %v159_v1 = vld [vmem:[%s404_s21] sm:$0xff]  ;;  %v160_v3 = vld [vmem:[%s404_s21 + $0x8] sm:$0xff] }
  0x1c   : > { %v175_v4 = vmax.f32 %v159_v1, %v167_v2  ;;  %v161_v6 = vld [vmem:[%s404_s21 + $0x10] sm:$0xff]  ;;  %v176_v8 = vmax.f32 %v160_v3, %v168_v5  ;;  %v162_v10 = vld [vmem:[%s404_s21 + $0x18] sm:$0xff] }
  0x1d   : > { %v177_v9 = vmax.f32 %v161_v6, %v169_v7  ;;  %v163_v12 = vld [vmem:[%s404_s21 + $0x20] sm:$0xff]  ;;  %v178_v13 = vmax.f32 %v162_v10, %v170_v11  ;;  %v164_v15 = vld [vmem:[%s404_s21 + $0x28] sm:$0xff] }
  0x1e   : > { %184 = vst.msk [vmem:[%s404_s21] sm:$0xff] %vm183_vm1, %v175_v4  ;;  %185 = vst.msk [vmem:[%s404_s21 + $0x8] sm:$0xff] %vm183_vm1, %v176_v8  ;;  %v179_v17 = vmax.f32 %v163_v12, %v171_v14  ;;  %v180_v18 = vmax.f32 %v164_v15, %v172_v16  ;;  %v165_v19 = vld [vmem:[%s404_s21 + $0x30] sm:$0xff]  ;;  %v166_v21 = vld [vmem:[%s404_s21 + $0x38] sm:$0xff] }
  0x1f   : > { %186 = vst.msk [vmem:[%s404_s21 + $0x10] sm:$0xff] %vm183_vm1, %v177_v9  ;;  %187 = vst.msk [vmem:[%s404_s21 + $0x18] sm:$0xff] %vm183_vm1, %v178_v13  ;;  %v181_v22 = vmax.f32 %v165_v19, %v173_v20  ;;  %v182_v24 = vmax.f32 %v166_v21, %v174_v23 }
  0x20   : > { %188 = vst.msk [vmem:[%s404_s21 + $0x20] sm:$0xff] %vm183_vm1, %v179_v17  ;;  %189 = vst.msk [vmem:[%s404_s21 + $0x28] sm:$0xff] %vm183_vm1, %v180_v18 }
  0x21   : > { %190 = vst.msk [vmem:[%s404_s21 + $0x30] sm:$0xff] %vm183_vm1, %v181_v22  ;;  %191 = vst.msk [vmem:[%s404_s21 + $0x38] sm:$0xff] %vm183_vm1, %v182_v24 }
  0x22 PF: > { %s11_s10 = sadd.s32 1, %s358_s10   ;;  %s468_s6 = smov %s350_s8 }
  0x23   : > { %p8_p8 = scmp.ge.s32.totalorder %s11_s10, 20   ;;  %s469_s7 = smov %s354_s9 }
  0x24   : > { %s470_s8 = smov %s473_s11  ;;  %s471_s9 = smov %s477_s12 }
  0x25   :  { %10 = sbr.rel (!%p8_p8) target bundleno = 3 (0x3), region = 58 }

</bundles_post_ra>
